<compile_context>
chip_gen: v6e
topology: v6e:2x2x1
jax: 0.10.0
libtpu: 0.0.40
codegen_flags: <defaults>
</compile_context>

<pallas_src>
import jax
import jax.numpy as jnp
from jax.experimental import pallas as pl
from jax.experimental.pallas import tpu as pltpu

# ----------------------------- static model config -----------------------------
N_EMBED = 32                 # n_units_embedding
H_DEC = 64                   # decoder hidden units
H_PRED = 64                  # predictor_n_units_hidden (small for the demo)
CONT_COLS = 3                # continuous (minmax -> tanh) encoded columns
DISC_BLOCKS = (4, 5)         # one-hot discrete blocks (softmax each)
N_FEATURES = CONT_COLS + sum(DISC_BLOCKS)   # 12 = data_encoder.n_features()
N_TARGET = 3                 # classification target -> softmax over 3 classes
LEAKY_SLOPE = 0.01           # torch default negative_slope for leaky_relu

H1 = H_DEC + H_PRED          # 128: fused layer-1 output width (exactly one 128-lane tile)
OUT_W = N_FEATURES + N_TARGET  # 15: single merged output [samples | labels]


def _leaky_relu(x):
    return jnp.where(x > 0, x, LEAKY_SLOPE * x)


# ------------------------------- Pallas kernel ---------------------------------
def fasd_generate_kernel(z_ref, w1_ref, w2_ref, w3_ref, b_ref, out_ref):
    z = z_ref[...]                                   # (TB, 32)
    b1 = b_ref[0:1, :]                               # (1, 128)  [bd1 | bp1]
    b2 = b_ref[1:2, :]                               # (1, 128)  [bd2 | bp2 | 0]
    b3 = b_ref[2:3, :N_TARGET]                       # (1, 3)    bp3

    # ---- fused layer 1: [decoder-hidden | predictor-hidden-1] -> (TB, 128) ----
    h = _leaky_relu(jnp.dot(z, w1_ref[...], preferred_element_type=jnp.float32) + b1)

    # ---- fused layer 2 (zero-padded block-diagonal weight) -> (TB, 128) ----
    # lanes 0..11: decoder raw feature logits, 12..75: predictor hidden-2 pre-act, 76..127: 0
    o2 = jnp.dot(h, w2_ref[...], preferred_element_type=jnp.float32) + b2

    # ---- decoder output activations on the full tile with static lane masks ----
    col = jax.lax.broadcasted_iota(jnp.int32, o2.shape, 1)
    NEG = -1e30                                      # large-negative fill (not -inf)

    blk_max = jnp.zeros_like(o2)
    off = CONT_COLS
    for bsz in DISC_BLOCKS:                          # static loop, 2 blocks
        m = (col >= off) & (col < off + bsz)
        bm = jnp.max(jnp.where(m, o2, NEG), axis=-1, keepdims=True)
        blk_max = jnp.where(m, bm, blk_max)
        off += bsz

    disc_mask = (col >= CONT_COLS) & (col < N_FEATURES)
    e = jnp.exp(jnp.where(disc_mask, o2 - blk_max, 0.0))   # one EUP exp pass, no overflow

    denom = jnp.ones_like(o2)
    off = CONT_COLS
    for bsz in DISC_BLOCKS:
        m = (col >= off) & (col < off + bsz)
        bs = jnp.sum(jnp.where(m, e, 0.0), axis=-1, keepdims=True)
        denom = jnp.where(m, bs, denom)
        off += bsz

    sm = e * pl.reciprocal(denom, approx=True)
    act = jnp.where(col < CONT_COLS, jnp.tanh(o2), sm)      # (TB, 128)
    x = act[:, :N_FEATURES]                                  # (TB, 12), lane-0-aligned slice

    # ---- predictor layer 3 + softmax over target classes (zero rows kill non-pred lanes) ----
    logits = jnp.dot(_leaky_relu(o2), w3_ref[...], preferred_element_type=jnp.float32) + b3
    lmax = jnp.max(logits, axis=-1, keepdims=True)
    le = jnp.exp(logits - lmax)
    y = le * pl.reciprocal(jnp.sum(le, axis=-1, keepdims=True), approx=True)   # (TB, 3)

    # ---- single merged store ----
    out_ref[...] = jnp.concatenate([x, y], axis=-1)


# --------------------------------- wrapper --------------------------------------
def fuse_params(params):
    """Build the fused / padded weights consumed by the kernel from per-layer params."""
    (wd1, bd1, wd2, bd2, wp1, bp1, wp2, bp2, wp3, bp3) = params

    w1 = jnp.concatenate([wd1, wp1], axis=1)                         # (32, 128)

    w2 = jnp.zeros((H1, H1), jnp.float32)                            # (128, 128)
    w2 = w2.at[:H_DEC, :N_FEATURES].set(wd2)                         # dec-hidden -> raw lanes
    w2 = w2.at[H_DEC:, N_FEATURES:N_FEATURES + H_PRED].set(wp2)      # pred-h1 -> pred-h2 lanes

    w3 = jnp.zeros((H1, N_TARGET), jnp.float32)                      # (128, 3)
    w3 = w3.at[N_FEATURES:N_FEATURES + H_PRED, :].set(wp3)

    b = jnp.zeros((3, H1), jnp.float32)                              # (3, 128), lane-aligned rows
    b = b.at[0, :].set(jnp.concatenate([bd1, bp1], axis=1)[0])
    b = b.at[1, :N_FEATURES].set(bd2[0])
    b = b.at[1, N_FEATURES:N_FEATURES + H_PRED].set(bp2[0])
    b = b.at[2, :N_TARGET].set(bp3[0])
    return w1, w2, w3, b


def _choose_batch_tile(count):
    # large tiles (per-grid-step overhead amortization), but keep >= 2 grid steps
    # when possible so v7x's two TensorCores both get work; cap at 1024 rows.
    return max(8, min(1024, (count // 2) // 8 * 8))


def fasd_generate(z, params, *, batch_tile=None):
    count = z.shape[0]
    w1, w2, w3, b = fuse_params(params)

    if batch_tile is None:
        batch_tile = _choose_batch_tile(count)

    padded = pl.cdiv(count, batch_tile) * batch_tile
    if padded != count:
        z = jnp.concatenate(
            [z, jnp.zeros((padded - count, N_EMBED), z.dtype)], axis=0)

    full = lambda a: pl.BlockSpec(a.shape, lambda i: (0, 0))   # tiny params: whole array
    in_specs = [
        pl.BlockSpec((batch_tile, N_EMBED), lambda i: (i, 0)),
        full(w1), full(w2), full(w3), full(b),
    ]
    out_specs = pl.BlockSpec((batch_tile, OUT_W), lambda i: (i, 0))
    out_shape = jax.ShapeDtypeStruct((padded, OUT_W), jnp.float32)

    out = pl.pallas_call(
        fasd_generate_kernel,
        grid=(padded // batch_tile,),
        in_specs=in_specs,
        out_specs=out_specs,
        out_shape=out_shape,
        compiler_params=pltpu.CompilerParams(
            dimension_semantics=("parallel",)),
    )(z, w1, w2, w3, b)

    return out[:count, :N_FEATURES], out[:count, N_FEATURES:]


def init_params(key):
    """Deterministic synthetic parameters (shapes follow FASD decoder / predictor MLPs)."""
    ks = jax.random.split(key, 10)
    def lin(kw, fan_in, fan_out):
        scale = 1.0 / jnp.sqrt(fan_in)
        w = jax.random.uniform(kw, (fan_in, fan_out), jnp.float32, -scale, scale)
        b = jnp.zeros((1, fan_out), jnp.float32)      # keep biases 2-D for TPU layout
        return w, b
    wd1, bd1 = lin(ks[0], N_EMBED, H_DEC)
    wd2, bd2 = lin(ks[1], H_DEC, N_FEATURES)
    wp1, bp1 = lin(ks[2], N_EMBED, H_PRED)
    wp2, bp2 = lin(ks[3], H_PRED, H_PRED)
    wp3, bp3 = lin(ks[4], H_PRED, N_TARGET)
    return (wd1, bd1, wd2, bd2, wp1, bp1, wp2, bp2, wp3, bp3)


def reference(z, params):
    """Pure-JAX reference of the same forward pass (un-fused weights)."""
    (wd1, bd1, wd2, bd2, wp1, bp1, wp2, bp2, wp3, bp3) = params
    h = _leaky_relu(z @ wd1 + bd1)
    raw = h @ wd2 + bd2
    parts = [jnp.tanh(raw[:, :CONT_COLS])]
    off = CONT_COLS
    for bsz in DISC_BLOCKS:
        parts.append(jax.nn.softmax(raw[:, off:off + bsz], axis=-1))
        off += bsz
    x = jnp.concatenate(parts, axis=-1)
    p = _leaky_relu(z @ wp1 + bp1)
    p = _leaky_relu(p @ wp2 + bp2)
    y = jax.nn.softmax(p @ wp3 + bp3, axis=-1)
    return x, y


if __name__ == "__main__":
    key = jax.random.PRNGKey(0)
    k_param, k_z = jax.random.split(key)

    params = init_params(k_param)

    count = 256  # forward(count) -> generate `count` synthetic rows
    # latent noise sampled outside the kernel (glue), matching FASD.generate
    z = jax.random.normal(k_z, (count, N_EMBED), dtype=jnp.float32)

    samples, labels = fasd_generate(z, params)     # auto batch_tile=128 -> grid=(2,)
    jax.block_until_ready((samples, labels))

    x_ref, y_ref = reference(z, params)
    assert samples.shape == (count, N_FEATURES)
    assert labels.shape == (count, N_TARGET)
    # approx-reciprocal softmax denominators -> ~1e-4 relative error budget
    assert jnp.allclose(samples, x_ref, atol=2e-3, rtol=2e-3)
    assert jnp.allclose(labels, y_ref, atol=2e-3, rtol=2e-3)

    print("KERNEL_OK")
</pallas_src>

<mosaic_0001>
module attributes {stable_mosaic.version = 11 : i64} {
  func.func @fasd_generate_kernel(%arg0: i32, %arg1: memref<128x32xf32, #tpu.memory_space<vmem>>, %arg2: memref<32x128xf32, #tpu.memory_space<vmem>>, %arg3: memref<128x128xf32, #tpu.memory_space<vmem>>, %arg4: memref<128x3xf32, #tpu.memory_space<vmem>>, %arg5: memref<3x128xf32, #tpu.memory_space<vmem>>, %arg6: memref<128x15xf32, #tpu.memory_space<vmem>>) attributes {dimension_semantics = [#tpu.dimension_semantics<parallel>], iteration_bounds = array<i64: 2>, scalar_prefetch = 0 : i64, scratch_operands = 0 : i64, tpu.core_type = #tpu.core_type<tc>, window_params = [{transform_indices = @transform_0, window_bounds = array<i64: 128, 32>}, {pipeline_mode = #tpu.pipeline_mode<synchronous>, transform_indices = @transform_1, window_bounds = array<i64: 32, 128>}, {pipeline_mode = #tpu.pipeline_mode<synchronous>, transform_indices = @transform_2, window_bounds = array<i64: 128, 128>}, {pipeline_mode = #tpu.pipeline_mode<synchronous>, transform_indices = @transform_3, window_bounds = array<i64: 128, 3>}, {pipeline_mode = #tpu.pipeline_mode<synchronous>, transform_indices = @transform_4, window_bounds = array<i64: 3, 128>}, {transform_indices = @transform_5, window_bounds = array<i64: 128, 15>}]} {
    %c0 = arith.constant 0 : index
    %c0_0 = arith.constant 0 : index
    %0 = vector.load %arg1[%c0, %c0_0] : memref<128x32xf32, #tpu.memory_space<vmem>>, vector<128x32xf32>
    %c0_1 = arith.constant 0 : index
    %c0_2 = arith.constant 0 : index
    %1 = vector.load %arg5[%c0_1, %c0_2] : memref<3x128xf32, #tpu.memory_space<vmem>>, vector<1x128xf32>
    %c1 = arith.constant 1 : index
    %c0_3 = arith.constant 0 : index
    %2 = vector.load %arg5[%c1, %c0_3] : memref<3x128xf32, #tpu.memory_space<vmem>>, vector<1x128xf32>
    %c2 = arith.constant 2 : index
    %c0_4 = arith.constant 0 : index
    %3 = vector.load %arg5[%c2, %c0_4] : memref<3x128xf32, #tpu.memory_space<vmem>>, vector<1x3xf32>
    %c0_5 = arith.constant 0 : index
    %c0_6 = arith.constant 0 : index
    %4 = vector.load %arg2[%c0_5, %c0_6] : memref<32x128xf32, #tpu.memory_space<vmem>>, vector<32x128xf32>
    %cst = arith.constant dense<0.000000e+00> : vector<128x128xf32>
    %5 = tpu.matmul %0, %4, %cst {dimension_numbers = #tpu.dot_dimension_numbers<[1], [0], [0], [1], [0, 0, 1, 1], [], []>} : vector<128x32xf32>, vector<32x128xf32>, vector<128x128xf32> -> vector<128x128xf32>
    %6 = vector.broadcast %1 : vector<1x128xf32> to vector<128x128xf32>
    %7 = arith.addf %5, %6 : vector<128x128xf32>
    %cst_7 = arith.constant 0.000000e+00 : f32
    %8 = vector.broadcast %cst_7 : f32 to vector<128x128xf32>
    %9 = arith.cmpf ogt, %7, %8 : vector<128x128xf32>
    %cst_8 = arith.constant 0.00999999977 : f32
    %10 = vector.broadcast %cst_8 : f32 to vector<128x128xf32>
    %11 = arith.mulf %10, %7 : vector<128x128xf32>
    %12 = arith.select %9, %7, %11 : vector<128x128xi1>, vector<128x128xf32>
    %c0_9 = arith.constant 0 : index
    %c0_10 = arith.constant 0 : index
    %13 = vector.load %arg3[%c0_9, %c0_10] : memref<128x128xf32, #tpu.memory_space<vmem>>, vector<128x128xf32>
    %cst_11 = arith.constant dense<0.000000e+00> : vector<128x128xf32>
    %14 = tpu.matmul %12, %13, %cst_11 {dimension_numbers = #tpu.dot_dimension_numbers<[1], [0], [0], [1], [0, 0, 1, 1], [], []>} : vector<128x128xf32>, vector<128x128xf32>, vector<128x128xf32> -> vector<128x128xf32>
    %15 = vector.broadcast %2 : vector<1x128xf32> to vector<128x128xf32>
    %16 = arith.addf %14, %15 : vector<128x128xf32>
    %17 = tpu.iota {dimensions = array<i32: 1>} : vector<128x128xi32>
    %cst_12 = arith.constant 0.000000e+00 : f32
    %18 = vector.broadcast %cst_12 : f32 to vector<128x128xf32>
    %c3_i32 = arith.constant 3 : i32
    %19 = vector.broadcast %c3_i32 : i32 to vector<128x128xi32>
    %20 = arith.cmpi sge, %17, %19 : vector<128x128xi32>
    %c7_i32 = arith.constant 7 : i32
    %21 = vector.broadcast %c7_i32 : i32 to vector<128x128xi32>
    %22 = arith.cmpi slt, %17, %21 : vector<128x128xi32>
    %23 = arith.andi %20, %22 : vector<128x128xi1>
    %cst_13 = arith.constant -1.000000e+30 : f32
    %24 = vector.broadcast %cst_13 : f32 to vector<128x128xf32>
    %25 = arith.select %23, %16, %24 : vector<128x128xi1>, vector<128x128xf32>
    %cst_14 = arith.constant dense<0xFF800000> : vector<128xf32>
    %26 = vector.multi_reduction <maximumf>, %25, %cst_14 [1] : vector<128x128xf32> to vector<128xf32>
    %27 = vector.shape_cast %26 : vector<128xf32> to vector<128x1xf32>
    %28 = vector.shape_cast %27 : vector<128x1xf32> to vector<128x1xf32>
    %29 = vector.broadcast %28 : vector<128x1xf32> to vector<128x128xf32>
    %30 = arith.select %23, %29, %18 : vector<128x128xi1>, vector<128x128xf32>
    %c7_i32_15 = arith.constant 7 : i32
    %31 = vector.broadcast %c7_i32_15 : i32 to vector<128x128xi32>
    %32 = arith.cmpi sge, %17, %31 : vector<128x128xi32>
    %c12_i32 = arith.constant 12 : i32
    %33 = vector.broadcast %c12_i32 : i32 to vector<128x128xi32>
    %34 = arith.cmpi slt, %17, %33 : vector<128x128xi32>
    %35 = arith.andi %32, %34 : vector<128x128xi1>
    %cst_16 = arith.constant -1.000000e+30 : f32
    %36 = vector.broadcast %cst_16 : f32 to vector<128x128xf32>
    %37 = arith.select %35, %16, %36 : vector<128x128xi1>, vector<128x128xf32>
    %cst_17 = arith.constant dense<0xFF800000> : vector<128xf32>
    %38 = vector.multi_reduction <maximumf>, %37, %cst_17 [1] : vector<128x128xf32> to vector<128xf32>
    %39 = vector.shape_cast %38 : vector<128xf32> to vector<128x1xf32>
    %40 = vector.shape_cast %39 : vector<128x1xf32> to vector<128x1xf32>
    %41 = vector.broadcast %40 : vector<128x1xf32> to vector<128x128xf32>
    %42 = arith.select %35, %41, %30 : vector<128x128xi1>, vector<128x128xf32>
    %c3_i32_18 = arith.constant 3 : i32
    %43 = vector.broadcast %c3_i32_18 : i32 to vector<128x128xi32>
    %44 = arith.cmpi sge, %17, %43 : vector<128x128xi32>
    %c12_i32_19 = arith.constant 12 : i32
    %45 = vector.broadcast %c12_i32_19 : i32 to vector<128x128xi32>
    %46 = arith.cmpi slt, %17, %45 : vector<128x128xi32>
    %47 = arith.andi %44, %46 : vector<128x128xi1>
    %48 = arith.subf %16, %42 : vector<128x128xf32>
    %cst_20 = arith.constant 0.000000e+00 : f32
    %49 = vector.broadcast %cst_20 : f32 to vector<128x128xf32>
    %50 = arith.select %47, %48, %49 : vector<128x128xi1>, vector<128x128xf32>
    %51 = math.exp %50 : vector<128x128xf32>
    %cst_21 = arith.constant 1.000000e+00 : f32
    %52 = vector.broadcast %cst_21 : f32 to vector<128x128xf32>
    %c3_i32_22 = arith.constant 3 : i32
    %53 = vector.broadcast %c3_i32_22 : i32 to vector<128x128xi32>
    %54 = arith.cmpi sge, %17, %53 : vector<128x128xi32>
    %c7_i32_23 = arith.constant 7 : i32
    %55 = vector.broadcast %c7_i32_23 : i32 to vector<128x128xi32>
    %56 = arith.cmpi slt, %17, %55 : vector<128x128xi32>
    %57 = arith.andi %54, %56 : vector<128x128xi1>
    %cst_24 = arith.constant 0.000000e+00 : f32
    %58 = vector.broadcast %cst_24 : f32 to vector<128x128xf32>
    %59 = arith.select %57, %51, %58 : vector<128x128xi1>, vector<128x128xf32>
    %cst_25 = arith.constant dense<0.000000e+00> : vector<128xf32>
    %60 = vector.multi_reduction <add>, %59, %cst_25 [1] : vector<128x128xf32> to vector<128xf32>
    %61 = vector.shape_cast %60 : vector<128xf32> to vector<128x1xf32>
    %62 = vector.shape_cast %61 : vector<128x1xf32> to vector<128x1xf32>
    %63 = vector.broadcast %62 : vector<128x1xf32> to vector<128x128xf32>
    %64 = arith.select %57, %63, %52 : vector<128x128xi1>, vector<128x128xf32>
    %c7_i32_26 = arith.constant 7 : i32
    %65 = vector.broadcast %c7_i32_26 : i32 to vector<128x128xi32>
    %66 = arith.cmpi sge, %17, %65 : vector<128x128xi32>
    %c12_i32_27 = arith.constant 12 : i32
    %67 = vector.broadcast %c12_i32_27 : i32 to vector<128x128xi32>
    %68 = arith.cmpi slt, %17, %67 : vector<128x128xi32>
    %69 = arith.andi %66, %68 : vector<128x128xi1>
    %cst_28 = arith.constant 0.000000e+00 : f32
    %70 = vector.broadcast %cst_28 : f32 to vector<128x128xf32>
    %71 = arith.select %69, %51, %70 : vector<128x128xi1>, vector<128x128xf32>
    %cst_29 = arith.constant dense<0.000000e+00> : vector<128xf32>
    %72 = vector.multi_reduction <add>, %71, %cst_29 [1] : vector<128x128xf32> to vector<128xf32>
    %73 = vector.shape_cast %72 : vector<128xf32> to vector<128x1xf32>
    %74 = vector.shape_cast %73 : vector<128x1xf32> to vector<128x1xf32>
    %75 = vector.broadcast %74 : vector<128x1xf32> to vector<128x128xf32>
    %76 = arith.select %69, %75, %64 : vector<128x128xi1>, vector<128x128xf32>
    %77 = tpu.reciprocal %76 {approx = true} : vector<128x128xf32> -> vector<128x128xf32>
    %78 = arith.mulf %51, %77 : vector<128x128xf32>
    %c3_i32_30 = arith.constant 3 : i32
    %79 = vector.broadcast %c3_i32_30 : i32 to vector<128x128xi32>
    %80 = arith.cmpi slt, %17, %79 : vector<128x128xi32>
    %81 = math.tanh %16 : vector<128x128xf32>
    %82 = arith.select %80, %81, %78 : vector<128x128xi1>, vector<128x128xf32>
    %83 = vector.extract_strided_slice %82 {offsets = [0, 0], sizes = [128, 12], strides = [1, 1]} : vector<128x128xf32> to vector<128x12xf32>
    %cst_31 = arith.constant 0.000000e+00 : f32
    %84 = vector.broadcast %cst_31 : f32 to vector<128x128xf32>
    %85 = arith.cmpf ogt, %16, %84 : vector<128x128xf32>
    %cst_32 = arith.constant 0.00999999977 : f32
    %86 = vector.broadcast %cst_32 : f32 to vector<128x128xf32>
    %87 = arith.mulf %86, %16 : vector<128x128xf32>
    %88 = arith.select %85, %16, %87 : vector<128x128xi1>, vector<128x128xf32>
    %c0_33 = arith.constant 0 : index
    %c0_34 = arith.constant 0 : index
    %89 = vector.load %arg4[%c0_33, %c0_34] : memref<128x3xf32, #tpu.memory_space<vmem>>, vector<128x3xf32>
    %cst_35 = arith.constant dense<0.000000e+00> : vector<128x3xf32>
    %90 = tpu.matmul %88, %89, %cst_35 {dimension_numbers = #tpu.dot_dimension_numbers<[1], [0], [0], [1], [0, 0, 1, 1], [], []>} : vector<128x128xf32>, vector<128x3xf32>, vector<128x3xf32> -> vector<128x3xf32>
    %91 = vector.broadcast %3 : vector<1x3xf32> to vector<128x3xf32>
    %92 = arith.addf %90, %91 : vector<128x3xf32>
    %cst_36 = arith.constant dense<0xFF800000> : vector<128xf32>
    %93 = vector.multi_reduction <maximumf>, %92, %cst_36 [1] : vector<128x3xf32> to vector<128xf32>
    %94 = vector.shape_cast %93 : vector<128xf32> to vector<128x1xf32>
    %95 = vector.broadcast %94 : vector<128x1xf32> to vector<128x3xf32>
    %96 = arith.subf %92, %95 : vector<128x3xf32>
    %97 = math.exp %96 : vector<128x3xf32>
    %cst_37 = arith.constant dense<0.000000e+00> : vector<128xf32>
    %98 = vector.multi_reduction <add>, %97, %cst_37 [1] : vector<128x3xf32> to vector<128xf32>
    %99 = vector.shape_cast %98 : vector<128xf32> to vector<128x1xf32>
    %100 = tpu.reciprocal %99 {approx = true} : vector<128x1xf32> -> vector<128x1xf32>
    %101 = vector.broadcast %100 : vector<128x1xf32> to vector<128x3xf32>
    %102 = arith.mulf %97, %101 : vector<128x3xf32>
    %103 = tpu.concatenate %83, %102 in 1 : vector<128x12xf32>, vector<128x3xf32> -> vector<128x15xf32>
    %c0_38 = arith.constant 0 : index
    %c0_39 = arith.constant 0 : index
    %104 = vector.load %arg6[%c0_38, %c0_39] : memref<128x15xf32, #tpu.memory_space<vmem>>, vector<128x15xf32>
    tpu.vector_store %arg6[%c0_38, %c0_39], %103 {strides = array<i32>} : memref<128x15xf32, #tpu.memory_space<vmem>>, vector<128x15xf32>,
    return
  }
  func.func @transform_0(%arg0: i32) -> (i32, i32) {
    %c0_i32 = arith.constant 0 : i32
    %c0_i32_0 = arith.constant 0 : i32
    return %arg0, %c0_i32 : i32, i32
  }
  func.func @transform_1(%arg0: i32) -> (i32, i32) {
    %c0_i32 = arith.constant 0 : i32
    %c0_i32_0 = arith.constant 0 : i32
    %c0_i32_1 = arith.constant 0 : i32
    return %c0_i32, %c0_i32_0 : i32, i32
  }
  func.func @transform_2(%arg0: i32) -> (i32, i32) {
    %c0_i32 = arith.constant 0 : i32
    %c0_i32_0 = arith.constant 0 : i32
    %c0_i32_1 = arith.constant 0 : i32
    return %c0_i32, %c0_i32_0 : i32, i32
  }
  func.func @transform_3(%arg0: i32) -> (i32, i32) {
    %c0_i32 = arith.constant 0 : i32
    %c0_i32_0 = arith.constant 0 : i32
    %c0_i32_1 = arith.constant 0 : i32
    return %c0_i32, %c0_i32_0 : i32, i32
  }
  func.func @transform_4(%arg0: i32) -> (i32, i32) {
    %c0_i32 = arith.constant 0 : i32
    %c0_i32_0 = arith.constant 0 : i32
    %c0_i32_1 = arith.constant 0 : i32
    return %c0_i32, %c0_i32_0 : i32, i32
  }
  func.func @transform_5(%arg0: i32) -> (i32, i32) {
    %c0_i32 = arith.constant 0 : i32
    %c0_i32_0 = arith.constant 0 : i32
    return %arg0, %c0_i32 : i32, i32
  }
}

</mosaic_0001>

<bundles_post_ra>
// kernel: tpu_custom_call.1
= control target key start
LH: loop header
LB: loop body
LE: loop exit
PB: predicated region body
PF: predicated region fallthrough
CT: control target
= control target key end

     0   :  { %s2098_s18 = smov 0   ;;  %s3310_s0 = inlined_call_operand.vmem [shape: f32[256,32], index: 0, kind: input, shape index: {}]   ;;  %s3311_s1 = inlined_call_operand.vmem [shape: f32[32,128], index: 1, kind: input, shape index: {}]   ;;  %s3312_s2 = inlined_call_operand.vmem [shape: f32[128,128], index: 2, kind: input, shape index: {}]   ;;  %s3313_s3 = inlined_call_operand.vmem [shape: f32[128,3], index: 3, kind: input, shape index: {}]   ;;  %s3314_s4 = inlined_call_operand.vmem [shape: f32[3,128], index: 4, kind: input, shape index: {}]   ;;  %s3315_s5 = inlined_call_operand.vmem [shape: f32[256,15], index: 5, kind: output, shape index: {}]  }
   0x1 LB: > { %s1600_s19 = sadd.s32 4294967295, %s2065_s18   ;;  %p1604_p0 = scmp.ge.s32.totalorder %s2065_s18, 1  ;;  %s2065_s18 = sphi %s2098_s18, %s15_s18  }
   0x2   : > { %p188_p1 = scmp.lt.s32.totalorder %s2065_s18, 3 }
   0x4   : > { %p189_p2 = pnand %p1604_p0, %p188_p1 }
   0x6   : > { %192 = sbr.rel (%p189_p2) target bundleno = 1140 (0x474), region = 40 }
   0xb   : > { %v250_v0 = vld [vmem:[%s3311_s1 + $0x18] sm:$0xff]  ;;  %v249_v1 = vld [vmem:[%s3311_s1 + $0x10] sm:$0xff]  ;;  %s1605_s24 = sshll.u32 %s1600_s19, 4  ;;  %v248_v4 = vld [vmem:[%s3311_s1 + $0x8] sm:$0xff]  ;;  %vm255_vm0 = vcmask 261120   ;;  %s2067_s12 = smov 12  }
   0xc   : > { %1714 = vmatprep.subr.mxu0 %v250_v0  ;;  %p217_p3 = scmp.lt.s32.totalorder %s1605_s24, 31  ;;  %v512_v2 = vld [vmem:[%s3312_s2 + $0x78] sm:$0xff]  ;;  %v511_v3 = vld [vmem:[%s3312_s2 + $0x70] sm:$0xff]  ;;  %v510_v5 = vld [vmem:[%s3312_s2 + $0x68] sm:$0xff] }
   0xd   : > { %1715 = vmatpush3.msra.mxu0 %v250_v0  ;;  %1746 = vmatprep.subr.mxu1 %v512_v2  ;;  %v247_v6 = vld [vmem:[%s3311_s1] sm:$0xff]  ;;  %v508_v11 = vld [vmem:[%s3312_s2 + $0x58] sm:$0xff]  ;;  %v507_v13 = vld [vmem:[%s3312_s2 + $0x50] sm:$0xff] }
   0xe   : > { %1716 = vmatprep.subr.mxu0 %v249_v1  ;;  %s3400_s24 = smov (!%p217_p3, %s1605_s24), 31  ;;  %1747 = vmatpush3.msra.mxu1 %v512_v2  ;;  %v509_v7 = vld [vmem:[%s3312_s2 + $0x60] sm:$0xff]  ;;  %v506_v15 = vld [vmem:[%s3312_s2 + $0x48] sm:$0xff]  ;;  %v504_v19 = vld [vmem:[%s3312_s2 + $0x38] sm:$0xff] }
   0xf   : > { %1717 = vmatpush3.msra.mxu0 %v249_v1  ;;  %1748 = vmatprep.subr.mxu1 %v511_v3  ;;  %s1606_s10 = sshll.u32 %s3400_s24, 3  ;;  %v505_v17 = vld [vmem:[%s3312_s2 + $0x40] sm:$0xff]  ;;  %v503_v21 = vld [vmem:[%s3312_s2 + $0x30] sm:$0xff]  ;;  %v502_v23 = vld [vmem:[%s3312_s2 + $0x28] sm:$0xff] }
  0x10   : > { %1718 = vmatprep.subr.mxu0 %v248_v4  ;;  %1749 = vmatpush3.msra.mxu1 %v511_v3  ;;  %s2135_s13 = scalar_lea.vmem %s3310_s0, %s1606_s10  ;;  %v501_v25 = vld [vmem:[%s3312_s2 + $0x20] sm:$0xff]  ;;  %v500_v32 = vld [vmem:[%s3312_s2 + $0x18] sm:$0xff]  ;;  %v499_v33 = vld [vmem:[%s3312_s2 + $0x10] sm:$0xff]  ;;  %s3172_s16 = scalar_lea.vmem %s3315_s5, %s1606_s10 }
  0x11   : > { %1719 = vmatpush3.msra.mxu0 %v248_v4  ;;  %1750 = vmatprep.subr.mxu1 %v510_v5  ;;  %v228_v8 = vld [vmem:[%s2135_s13] sm:$0xff]  ;;  %v229_v9 = vld [vmem:[%s2135_s13 + $0x8] sm:$0xff]  ;;  %v230_v10 = vld [vmem:[%s2135_s13 + $0x10] sm:$0xff] }
  0x12   : > { %1720 = vmatprep.subr.mxu0 %v247_v6  ;;  %1751 = vmatpush3.msra.mxu1 %v510_v5  ;;  %v231_v12 = vld [vmem:[%s2135_s13 + $0x18] sm:$0xff]  ;;  %v232_v14 = vld [vmem:[%s2135_s13 + $0x20] sm:$0xff]  ;;  %v233_v16 = vld [vmem:[%s2135_s13 + $0x28] sm:$0xff] }
  0x13   : > { %1721 = vmatpush3.msra.mxu0 %v247_v6  ;;  %1722 = vmatprep.mubr.msk.f32.mxu0 %vm255_vm0, %v228_v8  ;;  %v234_v18 = vld [vmem:[%s2135_s13 + $0x30] sm:$0xff]  ;;  %v235_v20 = vld [vmem:[%s2135_s13 + $0x38] sm:$0xff]  ;;  %v236_v22 = vld [vmem:[%s2135_s13 + $0x40] sm:$0xff] }
  0x14   : > { %1723 = vmatmul.mubr.msk.f32.vlgmr.msra.gmra.mxu0 %vm255_vm0, %v229_v9  ;;  %1752 = vmatprep.subr.mxu1 %v509_v7  ;;  %v237_v24 = vld [vmem:[%s2135_s13 + $0x48] sm:$0xff]  ;;  %v238_v26 = vld [vmem:[%s2135_s13 + $0x50] sm:$0xff]  ;;  %v239_v27 = vld [vmem:[%s2135_s13 + $0x58] sm:$0xff] }
  0x15   : > { %1725 = vmatprep.mubr.msk.f32.mxu0 %vm255_vm0, %v230_v10  ;;  %1753 = vmatpush3.msra.mxu1 %v509_v7  ;;  %v240_v28 = vld [vmem:[%s2135_s13 + $0x60] sm:$0xff]  ;;  %v241_v29 = vld [vmem:[%s2135_s13 + $0x68] sm:$0xff]  ;;  %v242_v30 = vld [vmem:[%s2135_s13 + $0x70] sm:$0xff] }
  0x16   : > { %1754 = vmatprep.subr.mxu1 %v508_v11  ;;  %v243_v31 = vld [vmem:[%s2135_s13 + $0x78] sm:$0xff]  ;;  %v498_v34 = vld [vmem:[%s3312_s2 + $0x8] sm:$0xff]  ;;  %v497_v35 = vld [vmem:[%s3312_s2] sm:$0xff] }
  0x17   : > { %1755 = vmatpush3.msra.mxu1 %v508_v11  ;;  %v1119_v36 = vld [vmem:[%s3313_s3 + $0x78] sm:$0xff]  ;;  %v2214_v37 = vld [vmem:[%s3313_s3 + $0x70] sm:$0xff]  ;;  %v2219_v38 = vld [vmem:[%s3313_s3 + $0x68] sm:$0xff] }
  0x18   : > { %1726 = vmatmul.mubr.msk.f32.gmra.mxu0 %vm255_vm0, %v231_v12  ;;  %1756 = vmatprep.subr.mxu1 %v507_v13  ;;  %v2226_v39 = vld [vmem:[%s3313_s3 + $0x60] sm:$0xff]  ;;  %v2233_v40 = vld [vmem:[%s3313_s3 + $0x58] sm:$0xff]  ;;  %v2240_v41 = vld [vmem:[%s3313_s3 + $0x50] sm:$0xff] }
  0x19   : > { %1728 = vmatprep.mubr.msk.f32.mxu0 %vm255_vm0, %v232_v14  ;;  %1757 = vmatpush3.msra.mxu1 %v507_v13  ;;  %v2247_v42 = vld [vmem:[%s3313_s3 + $0x48] sm:$0xff]  ;;  %v2254_v43 = vld [vmem:[%s3313_s3 + $0x40] sm:$0xff]  ;;  %v2261_v44 = vld [vmem:[%s3313_s3 + $0x38] sm:$0xff] }
  0x1a   : > { %1758 = vmatprep.subr.mxu1 %v506_v15  ;;  %1802 = vmatprep.subr.mxu0 %v1119_v36  ;;  %v2268_v45 = vld [vmem:[%s3313_s3 + $0x30] sm:$0xff]  ;;  %v2275_v46 = vld [vmem:[%s3313_s3 + $0x28] sm:$0xff]  ;;  %v2282_v47 = vld [vmem:[%s3313_s3 + $0x20] sm:$0xff] }
  0x1b   : > { %1759 = vmatpush3.msra.mxu1 %v506_v15  ;;  %1803 = vmatpush3.msra.mxu0 %v1119_v36  ;;  %v2291_v48 = vld [vmem:[%s3314_s4] ss:$0 sm:$0xff] }
  0x1c   : > { %1729 = vmatmul.mubr.msk.f32.gmra.mxu0 %vm255_vm0, %v233_v16  ;;  %1760 = vmatprep.subr.mxu1 %v505_v17 }
  0x1d   : > { %1731 = vmatprep.mubr.msk.f32.mxu0 %vm255_vm0, %v234_v18  ;;  %1761 = vmatpush3.msra.mxu1 %v505_v17 }
  0x1e   : > { %1762 = vmatprep.subr.mxu1 %v504_v19  ;;  %1804 = vmatprep.subr.mxu0 %v2214_v37 }
  0x1f   : > { %1763 = vmatpush3.msra.mxu1 %v504_v19  ;;  %1805 = vmatpush3.msra.mxu0 %v2214_v37 }
  0x20   : > { %1732 = vmatmul.mubr.msk.f32.gmra.mxu0 %vm255_vm0, %v235_v20  ;;  %1764 = vmatprep.subr.mxu1 %v503_v21 }
  0x21   : > { %1734 = vmatprep.mubr.msk.f32.mxu0 %vm255_vm0, %v236_v22  ;;  %1765 = vmatpush3.msra.mxu1 %v503_v21 }
  0x22   : > { %1766 = vmatprep.subr.mxu1 %v502_v23  ;;  %1806 = vmatprep.subr.mxu0 %v2219_v38 }
  0x23   : > { %1767 = vmatpush3.msra.mxu1 %v502_v23  ;;  %1807 = vmatpush3.msra.mxu0 %v2219_v38 }
  0x24   : > { %1735 = vmatmul.mubr.msk.f32.gmra.mxu0 %vm255_vm0, %v237_v24  ;;  %1768 = vmatprep.subr.mxu1 %v501_v25 }
  0x25   : > { %1737 = vmatprep.mubr.msk.f32.mxu0 %vm255_vm0, %v238_v26  ;;  %1769 = vmatpush3.msra.mxu1 %v501_v25 }
  0x26   : > { %1770 = vmatprep.subr.mxu1 %v500_v32  ;;  %1808 = vmatprep.subr.mxu0 %v2226_v39 }
  0x27   : > { %1771 = vmatpush3.msra.mxu1 %v500_v32  ;;  %1809 = vmatpush3.msra.mxu0 %v2226_v39 }
  0x28   : > { %1738 = vmatmul.mubr.msk.f32.gmra.mxu0 %vm255_vm0, %v239_v27  ;;  %1772 = vmatprep.subr.mxu1 %v499_v33 }
  0x29   : > { %1740 = vmatprep.mubr.msk.f32.mxu0 %vm255_vm0, %v240_v28  ;;  %1773 = vmatpush3.msra.mxu1 %v499_v33 }
  0x2a   : > { %1774 = vmatprep.subr.mxu1 %v498_v34  ;;  %1810 = vmatprep.subr.mxu0 %v2233_v40 }
  0x2b   : > { %1775 = vmatpush3.msra.mxu1 %v498_v34  ;;  %1811 = vmatpush3.msra.mxu0 %v2233_v40 }
  0x2c   : > { %1741 = vmatmul.mubr.msk.f32.gmra.mxu0 %vm255_vm0, %v241_v29  ;;  %1776 = vmatprep.subr.mxu1 %v497_v35 }
  0x2d   : > { %1743 = vmatprep.mubr.msk.f32.mxu0 %vm255_vm0, %v242_v30  ;;  %1777 = vmatpush3.msra.mxu1 %v497_v35 }
  0x2e   : > { %1858 = vmatprep.subr.mxu1 %v1119_v36  ;;  %1812 = vmatprep.subr.mxu0 %v2240_v41 }
  0x2f   : > { %1813 = vmatpush3.msra.mxu0 %v2240_v41 }
  0x30   : > { %1744 = vmatmul.mubr.msk.f32.gmra.mxu0 %vm255_vm0, %v243_v31  ;;  %1814 = vmatprep.subr.mxu0 %v2247_v42 }
  0x31   : > { %1815 = vmatpush3.msra.mxu0 %v2247_v42 }
  0x32   : > { %1816 = vmatprep.subr.mxu0 %v2254_v43 }
  0x33   : > { %1817 = vmatpush3.msra.mxu0 %v2254_v43 }
  0x34   : > { %1818 = vmatprep.subr.mxu0 %v2261_v44 }
  0x35   : > { %1819 = vmatpush3.msra.mxu0 %v2261_v44 }
  0x36   : > { %1820 = vmatprep.subr.mxu0 %v2268_v45 }
  0x37   : > { %1821 = vmatpush3.msra.mxu0 %v2268_v45 }
  0x38   : > { %1822 = vmatprep.subr.mxu0 %v2275_v46 }
  0x39   : > { %1823 = vmatpush3.msra.mxu0 %v2275_v46 }
  0x3a   : > { %1824 = vmatprep.subr.mxu0 %v2282_v47 }
  0x3b   : > { %1825 = vmatpush3.msra.mxu0 %v2282_v47 }
  0xd4   : > { %v1724_v49 = vpop.f32.mrf.mxu0 }
  0xd5   : > { %v376_v50 = vadd.f32 %v1724_v49, %v2291_v48 }
  0xd6   : > { %v370_v51 = vpop.f32.mrf.mxu0 }
  0xd7   : > { %v371_v52 = vadd.f32 %v2291_v48, %v370_v51  ;;  %v466_v53 = vmul.f32 0.01, %v376_v50  ;;  %vm450_vm2 = vcmp.gt.f32.partialorder %v376_v50, 0.0 }
  0xd8   : > { %v1727_v54 = vpop.f32.mrf.mxu0 }
  0xd9   : > { %v386_v55 = vadd.f32 %v1727_v54, %v2291_v48  ;;  %vm449_vm1 = vcmp.gt.f32.partialorder %v371_v52, 0.0  ;;  %v465_v56 = vmul.f32 0.01, %v371_v52  ;;  %v482_v62 = vsel %vm450_vm2, %v376_v50, %v466_v53 }
  0xda   : > { %v380_v57 = vpop.f32.mrf.mxu0  ;;  %v662_v53 = vlaneseq }
  0xdb   : > { %v381_v58 = vadd.f32 %v2291_v48, %v380_v57  ;;  %v481_v59 = vsel %vm449_vm1, %v371_v52, %v465_v56  ;;  %v468_v60 = vmul.f32 0.01, %v386_v55  ;;  %vm452_vm4 = vcmp.gt.f32.partialorder %v386_v55, 0.0  ;;  %v1104_v52 = vld [vmem:[%s3313_s3] sm:$0xff] }
  0xdc   : > { %v1730_v61 = vpop.f32.mrf.mxu0  ;;  %1778 = vmatprep.mubr.f32.mxu1 %v481_v59  ;;  %v2343_v54 = vand.u32 127, %v662_v53 }
  0xdd   : > { %v467_v63 = vmul.f32 0.01, %v381_v58  ;;  %v396_v0 = vadd.f32 %v1730_v61, %v2291_v48  ;;  %1779 = vmatmul.mubr.f32.vlgmr.msra.gmra.mxu1 %v482_v62  ;;  %vm451_vm3 = vcmp.gt.f32.partialorder %v381_v58, 0.0  ;;  %v484_v6 = vsel %vm452_vm4, %v386_v55, %v468_v60  ;;  %v2350_v55 = vld [vmem:[%s3314_s4 + $0x1] ss:$0 sm:$0xff] }
  0xde   : > { %v390_v1 = vpop.f32.mrf.mxu0  ;;  %1874 = vmatpush3.msra.mxu1 %v1119_v36  ;;  %3343 = vst [vmem:[#allocation2_spill] sm:$0xff] %v2343_v54  ;;  %vm664_vm1 = vcmp.ge.s32.totalorder %v2343_v54, 3  ;;  %vm665_vm2 = vcmp.lt.s32.totalorder %v2343_v54, 7  ;;  %vm731_vm4 = vcmp.ge.s32.totalorder %v2343_v54, 7 }
  0xdf   : > { %v470_v2 = vmul.f32 0.01, %v396_v0  ;;  %v391_v3 = vadd.f32 %v2291_v48, %v390_v1  ;;  %v483_v4 = vsel %vm451_vm3, %v381_v58, %v467_v63  ;;  %vm454_vm5 = vcmp.gt.f32.partialorder %v396_v0, 0.0  ;;  %1859 = vmatprep.subr.mxu1 %v2214_v37  ;;  %vm2354_vm3 = vmand %vm664_vm1, %vm665_vm2 }
  0xe0   : > { %v1733_v5 = vpop.f32.mrf.mxu0  ;;  %1781 = vmatprep.mubr.f32.mxu1 %v483_v4  ;;  %1875 = vmatpush3.msra.mxu1 %v2214_v37 }
  0xe1   : > { %v469_v7 = vmul.f32 0.01, %v391_v3  ;;  %v406_v8 = vadd.f32 %v1733_v5, %v2291_v48  ;;  %1782 = vmatmul.mubr.f32.gmra.mxu1 %v484_v6  ;;  %vm453_vm6 = vcmp.gt.f32.partialorder %v391_v3, 0.0  ;;  %1860 = vmatprep.subr.mxu1 %v2219_v38  ;;  %v486_v10 = vsel %vm454_vm5, %v396_v0, %v470_v2 }
  0xe2   : > { %v400_v9 = vpop.f32.mrf.mxu0  ;;  %1876 = vmatpush3.msra.mxu1 %v2219_v38  ;;  %vm732_vm5 = vcmp.lt.s32.totalorder %v2343_v54, 12 }
  0xe3   : > { %v472_v11 = vmul.f32 0.01, %v406_v8  ;;  %v401_v12 = vadd.f32 %v2291_v48, %v400_v9  ;;  %v485_v13 = vsel %vm453_vm6, %v391_v3, %v469_v7  ;;  %vm456_vm7 = vcmp.gt.f32.partialorder %v406_v8, 0.0  ;;  %1861 = vmatprep.subr.mxu1 %v2226_v39  ;;  %vm2371_vm6 = vmand %vm731_vm4, %vm732_vm5 }
  0xe4   : > { %v1736_v14 = vpop.f32.mrf.mxu0  ;;  %1784 = vmatprep.mubr.f32.mxu1 %v485_v13  ;;  %1877 = vmatpush3.msra.mxu1 %v2226_v39 }
  0xe5   : > { %v471_v15 = vmul.f32 0.01, %v401_v12  ;;  %v416_v16 = vadd.f32 %v1736_v14, %v2291_v48  ;;  %1785 = vmatmul.mubr.f32.gmra.mxu1 %v486_v10  ;;  %vm455_vm8 = vcmp.gt.f32.partialorder %v401_v12, 0.0  ;;  %1862 = vmatprep.subr.mxu1 %v2233_v40  ;;  %v488_v18 = vsel %vm456_vm7, %v406_v8, %v472_v11 }
  0xe6   : > { %v410_v17 = vpop.f32.mrf.mxu0  ;;  %1878 = vmatpush3.msra.mxu1 %v2233_v40 }
  0xe7   : > { %v474_v19 = vmul.f32 0.01, %v416_v16  ;;  %v411_v20 = vadd.f32 %v2291_v48, %v410_v17  ;;  %v487_v21 = vsel %vm455_vm8, %v401_v12, %v471_v15  ;;  %vm458_vm9 = vcmp.gt.f32.partialorder %v416_v16, 0.0  ;;  %1863 = vmatprep.subr.mxu1 %v2240_v41 }
  0xe8   : > { %v1739_v22 = vpop.f32.mrf.mxu0  ;;  %1787 = vmatprep.mubr.f32.mxu1 %v487_v21  ;;  %1879 = vmatpush3.msra.mxu1 %v2240_v41 }
  0xe9   : > { %v473_v23 = vmul.f32 0.01, %v411_v20  ;;  %v426_v24 = vadd.f32 %v1739_v22, %v2291_v48  ;;  %1788 = vmatmul.mubr.f32.gmra.mxu1 %v488_v18  ;;  %vm457_vm10 = vcmp.gt.f32.partialorder %v411_v20, 0.0  ;;  %1864 = vmatprep.subr.mxu1 %v2247_v42  ;;  %v490_v26 = vsel %vm458_vm9, %v416_v16, %v474_v19 }
  0xea   : > { %v420_v25 = vpop.f32.mrf.mxu0  ;;  %1880 = vmatpush3.msra.mxu1 %v2247_v42 }
  0xeb   : > { %v476_v27 = vmul.f32 0.01, %v426_v24  ;;  %v421_v28 = vadd.f32 %v2291_v48, %v420_v25  ;;  %v489_v29 = vsel %vm457_vm10, %v411_v20, %v473_v23  ;;  %vm460_vm11 = vcmp.gt.f32.partialorder %v426_v24, 0.0  ;;  %1865 = vmatprep.subr.mxu1 %v2254_v43 }
  0xec   : > { %v1742_v30 = vpop.f32.mrf.mxu0  ;;  %1790 = vmatprep.mubr.f32.mxu1 %v489_v29  ;;  %1881 = vmatpush3.msra.mxu1 %v2254_v43 }
  0xed   : > { %v475_v31 = vmul.f32 0.01, %v421_v28  ;;  %v436_v32 = vadd.f32 %v1742_v30, %v2291_v48  ;;  %1791 = vmatmul.mubr.f32.gmra.mxu1 %v490_v26  ;;  %vm459_vm12 = vcmp.gt.f32.partialorder %v421_v28, 0.0  ;;  %1866 = vmatprep.subr.mxu1 %v2261_v44  ;;  %v492_v34 = vsel %vm460_vm11, %v426_v24, %v476_v27 }
  0xee   : > { %v430_v33 = vpop.f32.mrf.mxu0  ;;  %1882 = vmatpush3.msra.mxu1 %v2261_v44 }
  0xef   : > { %v478_v35 = vmul.f32 0.01, %v436_v32  ;;  %v431_v36 = vadd.f32 %v2291_v48, %v430_v33  ;;  %v491_v37 = vsel %vm459_vm12, %v421_v28, %v475_v31  ;;  %vm462_vm13 = vcmp.gt.f32.partialorder %v436_v32, 0.0  ;;  %1867 = vmatprep.subr.mxu1 %v2268_v45 }
  0xf0   : > { %v1745_v38 = vpop.f32.mrf.mxu0  ;;  %1793 = vmatprep.mubr.f32.mxu1 %v491_v37  ;;  %1883 = vmatpush3.msra.mxu1 %v2268_v45 }
  0xf1   : > { %v477_v39 = vmul.f32 0.01, %v431_v36  ;;  %v446_v40 = vadd.f32 %v1745_v38, %v2291_v48  ;;  %1794 = vmatmul.mubr.f32.gmra.mxu1 %v492_v34  ;;  %vm461_vm14 = vcmp.gt.f32.partialorder %v431_v36, 0.0  ;;  %1868 = vmatprep.subr.mxu1 %v2275_v46  ;;  %v494_v42 = vsel %vm462_vm13, %v436_v32, %v478_v35 }
  0xf2   : > { %v440_v41 = vpop.f32.mrf.mxu0  ;;  %1884 = vmatpush3.msra.mxu1 %v2275_v46  ;;  %v1107_v46 = vld [vmem:[%s3313_s3 + $0x18] sm:$0xff] }
  0xf3   : > { %v480_v43 = vmul.f32 0.01, %v446_v40  ;;  %v441_v44 = vadd.f32 %v2291_v48, %v440_v41  ;;  %v493_v49 = vsel %vm461_vm14, %v431_v36, %v477_v39  ;;  %vm464_vm15 = vcmp.gt.f32.partialorder %v446_v40, 0.0  ;;  %1869 = vmatprep.subr.mxu1 %v2282_v47  ;;  %1826 = vmatprep.subr.mxu0 %v1107_v46  ;;  %v1106_v48 = vld [vmem:[%s3313_s3 + $0x10] sm:$0xff] }
  0xf4   : > { %1796 = vmatprep.mubr.f32.mxu1 %v493_v49  ;;  %1885 = vmatpush3.msra.mxu1 %v2282_v47  ;;  %v1105_v47 = vld [vmem:[%s3313_s3 + $0x8] sm:$0xff] }
  0xf5   : > { %v479_v45 = vmul.f32 0.01, %v441_v44  ;;  %1797 = vmatmul.mubr.f32.gmra.mxu1 %v494_v42  ;;  %vm463_vm0 = vcmp.gt.f32.partialorder %v441_v44, 0.0  ;;  %v496_v50 = vsel %vm464_vm15, %v446_v40, %v480_v43  ;;  %1870 = vmatprep.subr.mxu1 %v1107_v46 }
  0xf6   : > { %1827 = vmatpush3.msra.mxu0 %v1107_v46  ;;  %1886 = vmatpush3.msra.mxu1 %v1107_v46 }
  0xf7   : > { %v495_v51 = vsel %vm463_vm0, %v441_v44, %v479_v45  ;;  %1828 = vmatprep.subr.mxu0 %v1106_v48  ;;  %1871 = vmatprep.subr.mxu1 %v1106_v48 }
  0xf8   : > { %1799 = vmatprep.mubr.f32.mxu1 %v495_v51  ;;  %1829 = vmatpush3.msra.mxu0 %v1106_v48 }
  0xf9   : > { %1800 = vmatmul.mubr.f32.gmra.mxu1 %v496_v50  ;;  %1830 = vmatprep.subr.mxu0 %v1105_v47 }
  0xfa   : > { %1887 = vmatpush3.msra.mxu1 %v1106_v48  ;;  %1831 = vmatpush3.msra.mxu0 %v1105_v47 }
  0xfb   : > { %1872 = vmatprep.subr.mxu1 %v1105_v47  ;;  %1832 = vmatprep.subr.mxu0 %v1104_v52 }
  0xfc   : > { %1888 = vmatpush3.msra.mxu1 %v1105_v47  ;;  %1833 = vmatpush3.msra.mxu0 %v1104_v52 }
  0xfd   : > { %1873 = vmatprep.subr.mxu1 %v1104_v52 }
  0xfe   : > { %1889 = vmatpush3.msra.mxu1 %v1104_v52 }
 0x19d   : > { %v1780_v56 = vpop.f32.mrf.mxu1 }
 0x19e   : > { %v2359_v58 = vadd.f32 %v1780_v56, %v2350_v55 }
 0x19f   : > { %v583_v59 = vpop.f32.mrf.mxu1 }
 0x1a0   : > { %3346 = vst [vmem:[#allocation3_spill] sm:$0xff] %v2359_v58  ;;  %v2364_v60 = vadd.f32 %v2350_v55, %v583_v59  ;;  %v668_v61 = vsel %vm2354_vm3, %v2359_v58, -1e+30  ;;  %v1073_v0 = vmul.f32 0.01, %v2359_v58  ;;  %vm1057_vm8 = vcmp.gt.f32.partialorder %v2359_v58, 0.0 }
 0x1a1   : > { %685 = vmax.xlane.f32.xlu1 %v668_v61  ;;  %v1783_v62 = vpop.f32.mrf.mxu1  ;;  %v735_v6 = vsel %vm2371_vm6, %v2359_v58, -1e+30 }
 0x1a2   : > { %3347 = vst [vmem:[#allocation4_spill] sm:$0xff] %v2364_v60  ;;  %v2377_v1 = vadd.f32 %v1783_v62, %v2350_v55  ;;  %v667_v2 = vsel %vm2354_vm3, %v2364_v60, -1e+30  ;;  %vm1056_vm7 = vcmp.gt.f32.partialorder %v2364_v60, 0.0  ;;  %v1072_v4 = vmul.f32 0.01, %v2364_v60 }
 0x1a3   : > { %v593_v3 = vpop.f32.mrf.mxu1  ;;  %683 = vmax.xlane.f32.xlu0 %v667_v2  ;;  %v1089_v9 = vsel %vm1057_vm8, %v2359_v58, %v1073_v0  ;;  %v734_v10 = vsel %vm2371_vm6, %v2364_v60, -1e+30 }
 0x1a4   : > { %3350 = vst [vmem:[#allocation5_spill] sm:$0xff] %v2377_v1  ;;  %v2386_v5 = vadd.f32 %v2350_v55, %v593_v3  ;;  %v1088_v8 = vsel %vm1056_vm7, %v2364_v60, %v1072_v4  ;;  %v1075_v11 = vmul.f32 0.01, %v2377_v1  ;;  %vm1059_vm10 = vcmp.gt.f32.partialorder %v2377_v1, 0.0 }
 0x1a5   : > { %752 = vmax.xlane.f32.xlu1 %v735_v6  ;;  %v1786_v7 = vpop.f32.mrf.mxu1  ;;  %1834 = vmatprep.mubr.f32.mxu0 %v1088_v8  ;;  %v670_v16 = vsel %vm2354_vm3, %v2377_v1, -1e+30  ;;  %v737_v26 = vsel %vm2371_vm6, %v2377_v1, -1e+30 }
 0x1a6   : > { %3351 = vst [vmem:[#allocation6_spill] sm:$0xff] %v2386_v5  ;;  %v2398_v12 = vadd.f32 %v1786_v7, %v2350_v55  ;;  %vm1058_vm9 = vcmp.gt.f32.partialorder %v2386_v5, 0.0  ;;  %v1074_v13 = vmul.f32 0.01, %v2386_v5  ;;  %1835 = vmatmul.mubr.f32.vlgmr.msra.gmra.mxu0 %v1089_v9  ;;  %v1091_v19 = vsel %vm1059_vm10, %v2377_v1, %v1075_v11 }
 0x1a7   : > { %v603_v14 = vpop.f32.mrf.mxu1  ;;  %750 = vmax.xlane.f32.xlu0 %v734_v10  ;;  %v669_v20 = vsel %vm2354_vm3, %v2386_v5, -1e+30  ;;  %v736_v30 = vsel %vm2371_vm6, %v2386_v5, -1e+30 }
 0x1a8   : > { %v2404_v15 = vadd.f32 %v2350_v55, %v603_v14  ;;  %v1090_v17 = vsel %vm1058_vm9, %v2386_v5, %v1074_v13  ;;  %v1077_v21 = vmul.f32 0.01, %v2398_v12  ;;  %vm1061_vm12 = vcmp.gt.f32.partialorder %v2398_v12, 0.0 }
 0x1a9   : > { %689 = vmax.xlane.f32.xlu1 %v670_v16  ;;  %v1789_v18 = vpop.f32.mrf.mxu1  ;;  %1837 = vmatprep.mubr.f32.mxu0 %v1090_v17  ;;  %v672_v36 = vsel %vm2354_vm3, %v2398_v12, -1e+30 }
 0x1aa   : > { %v2416_v22 = vadd.f32 %v1789_v18, %v2350_v55  ;;  %vm1060_vm11 = vcmp.gt.f32.partialorder %v2404_v15, 0.0  ;;  %v1076_v23 = vmul.f32 0.01, %v2404_v15  ;;  %1838 = vmatmul.mubr.f32.gmra.mxu0 %v1091_v19  ;;  %v1093_v29 = vsel %vm1061_vm12, %v2398_v12, %v1077_v21  ;;  %vm2627_vm12 = vmand %vm664_vm1, %vm732_vm5 }
 0x1ab   : > { %v613_v24 = vpop.f32.mrf.mxu1  ;;  %687 = vmax.xlane.f32.xlu0 %v669_v20  ;;  %v671_v40 = vsel %vm2354_vm3, %v2404_v15, -1e+30  ;;  %vm1510_vm5 = vcmask 97280  }
 0x1ac   : > { %v2422_v25 = vadd.f32 %v2350_v55, %v613_v24  ;;  %v1092_v27 = vsel %vm1060_vm11, %v2404_v15, %v1076_v23  ;;  %v1079_v31 = vmul.f32 0.01, %v2416_v22  ;;  %vm1063_vm14 = vcmp.gt.f32.partialorder %v2416_v22, 0.0  ;;  %v2525_v24 = vld [vmem:[%s3314_s4 + $0x2] ss:$0 sm:$0xff] }
 0x1ad   : > { %756 = vmax.xlane.f32.xlu1 %v737_v26  ;;  %v1792_v28 = vpop.f32.mrf.mxu1  ;;  %1840 = vmatprep.mubr.f32.mxu0 %v1092_v27  ;;  %v674_v45 = vsel %vm2354_vm3, %v2416_v22, -1e+30  ;;  %vm1269_vm11 = vcmask 23552  }
 0x1ae   : > { %v2434_v32 = vadd.f32 %v1792_v28, %v2350_v55  ;;  %vm1062_vm13 = vcmp.gt.f32.partialorder %v2422_v25, 0.0  ;;  %v1078_v33 = vmul.f32 0.01, %v2422_v25  ;;  %1841 = vmatmul.mubr.f32.gmra.mxu0 %v1093_v29  ;;  %v1095_v39 = vsel %vm1063_vm14, %v2416_v22, %v1079_v31 }
 0x1af   : > { %v623_v34 = vpop.f32.mrf.mxu1  ;;  %754 = vmax.xlane.f32.xlu0 %v736_v30  ;;  %v673_v48 = vsel %vm2354_vm3, %v2422_v25, -1e+30 }
 0x1b0   : > { %v2440_v35 = vadd.f32 %v2350_v55, %v623_v34  ;;  %v1094_v37 = vsel %vm1062_vm13, %v2422_v25, %v1078_v33  ;;  %v1081_v41 = vmul.f32 0.01, %v2434_v32  ;;  %vm1065_vm0 = vcmp.gt.f32.partialorder %v2434_v32, 0.0 }
 0x1b1   : > { %693 = vmax.xlane.f32.xlu1 %v672_v36  ;;  %v1795_v38 = vpop.f32.mrf.mxu1  ;;  %1843 = vmatprep.mubr.f32.mxu0 %v1094_v37  ;;  %v676_v61 = vsel %vm2354_vm3, %v2434_v32, -1e+30  ;;  %vm1527_vm13 = vcmask 121856  }
 0x1b2   : > { %v2452_v42 = vadd.f32 %v1795_v38, %v2350_v55  ;;  %vm1064_vm15 = vcmp.gt.f32.partialorder %v2440_v35, 0.0  ;;  %v1080_v43 = vmul.f32 0.01, %v2440_v35  ;;  %1844 = vmatmul.mubr.f32.gmra.mxu0 %v1095_v39  ;;  %v1097_v46 = vsel %vm1065_vm0, %v2434_v32, %v1081_v41 }
 0x1b3   : > { %v633_v44 = vpop.f32.mrf.mxu1  ;;  %691 = vmax.xlane.f32.xlu0 %v671_v40  ;;  %v675_v3 = vsel %vm2354_vm3, %v2440_v35, -1e+30 }
 0x1b4   : > { %v2458_v49 = vadd.f32 %v2350_v55, %v633_v44  ;;  %v1096_v50 = vsel %vm1064_vm15, %v2440_v35, %v1080_v43  ;;  %v1083_v47 = vmul.f32 0.01, %v2452_v42  ;;  %vm1067_vm4 = vcmp.gt.f32.partialorder %v2452_v42, 0.0 }
 0x1b5   : > { %697 = vmax.xlane.f32.xlu1 %v674_v45  ;;  %v1798_v51 = vpop.f32.mrf.mxu1  ;;  %1846 = vmatprep.mubr.f32.mxu0 %v1096_v50  ;;  %v678_v10 = vsel %vm2354_vm3, %v2452_v42, -1e+30 }
 0x1b6   : > { %v2470_v52 = vadd.f32 %v1798_v51, %v2350_v55  ;;  %vm1066_vm2 = vcmp.gt.f32.partialorder %v2458_v49, 0.0  ;;  %v1082_v53 = vmul.f32 0.01, %v2458_v49  ;;  %1847 = vmatmul.mubr.f32.gmra.mxu0 %v1097_v46  ;;  %v1099_v2 = vsel %vm1067_vm4, %v2452_v42, %v1083_v47 }
 0x1b7   : > { %v643_v56 = vpop.f32.mrf.mxu1  ;;  %695 = vmax.xlane.f32.xlu0 %v673_v48  ;;  %v677_v13 = vsel %vm2354_vm3, %v2458_v49, -1e+30 }
 0x1b8   : > { %3352 = vst [vmem:[#allocation7_spill] sm:$0xff] %v2470_v52  ;;  %v2476_v59 = vadd.f32 %v2350_v55, %v643_v56  ;;  %v1098_v62 = vsel %vm1066_vm2, %v2458_v49, %v1082_v53  ;;  %v1085_v7 = vmul.f32 0.01, %v2470_v52  ;;  %vm1069_vm8 = vcmp.gt.f32.partialorder %v2470_v52, 0.0 }
 0x1b9   : > { %701 = vmax.xlane.f32.xlu1 %v676_v61  ;;  %v1801_v0 = vpop.f32.mrf.mxu1  ;;  %1849 = vmatprep.mubr.f32.mxu0 %v1098_v62  ;;  %v680_v17 = vsel %vm2354_vm3, %v2470_v52, -1e+30 }
 0x1ba   : > { %v2487_v4 = vadd.f32 %v1801_v0, %v2350_v55  ;;  %vm1068_vm7 = vcmp.gt.f32.partialorder %v2476_v59, 0.0  ;;  %v1084_v6 = vmul.f32 0.01, %v2476_v59  ;;  %1850 = vmatmul.mubr.f32.gmra.mxu0 %v1099_v2  ;;  %v1101_v16 = vsel %vm1069_vm8, %v2470_v52, %v1085_v7 }
 0x1bb   : > { %v653_v8 = vpop.f32.mrf.mxu1  ;;  %699 = vmax.xlane.f32.xlu0 %v675_v3  ;;  %v679_v20 = vsel %vm2354_vm3, %v2476_v59, -1e+30 }
 0x1bc   : > { %3353 = vst [vmem:[#allocation8_spill] sm:$0xff] %v2487_v4  ;;  %v2494_v9 = vadd.f32 %v2350_v55, %v653_v8  ;;  %v1100_v11 = vsel %vm1068_vm7, %v2476_v59, %v1084_v6  ;;  %v1087_v14 = vmul.f32 0.01, %v2487_v4  ;;  %vm1071_vm10 = vcmp.gt.f32.partialorder %v2487_v4, 0.0 }
 0x1bd   : > { %705 = vmax.xlane.f32.xlu1 %v678_v10  ;;  %1852 = vmatprep.mubr.f32.mxu0 %v1100_v11  ;;  %v682_v21 = vsel %vm2354_vm3, %v2487_v4, -1e+30 }
 0x1be   : > { %vm1070_vm9 = vcmp.gt.f32.partialorder %v2494_v9, 0.0  ;;  %v1086_v55 = vmul.f32 0.01, %v2494_v9  ;;  %1853 = vmatmul.mubr.f32.gmra.mxu0 %v1101_v16  ;;  %v1103_v19 = vsel %vm1071_vm10, %v2487_v4, %v1087_v14  ;;  %v681_v23 = vsel %vm2354_vm3, %v2494_v9, -1e+30 }
 0x1bf   : > { %703 = vmax.xlane.f32.xlu0 %v677_v13 }
 0x1c0   : > { %v1102_v18 = vsel %vm1070_vm9, %v2494_v9, %v1086_v55 }
 0x1c1   : > { %709 = vmax.xlane.f32.xlu1 %v680_v17  ;;  %1855 = vmatprep.mubr.f32.mxu1 %v1102_v18 }
 0x1c2   : > { %1856 = vmatmul.mubr.f32.vlgmr.msra.gmra.mxu1 %v1103_v19 }
 0x1c3   : > { %707 = vmax.xlane.f32.xlu0 %v679_v20 }
 0x1c5   : > { %713 = vmax.xlane.f32.xlu1 %v682_v21 }
 0x1c7   : > { %711 = vmax.xlane.f32.xlu0 %v681_v23 }
 0x22a   : > { %v686_v56 = vpop.xlane.xlu1 %685 }
 0x22c   : > { %v684_v51 = vpop.xlane.xlu0 %683 }
 0x22e   : > { %v753_v11 = vpop.xlane.xlu1 %752 }
 0x230   : > { %v751_v7 = vpop.xlane.xlu0 %750 }
 0x234   : > { %v688_v19 = vpop.xlane.xlu0 %687 }
 0x266   : > { %v1836_v26 = vpop.f32.mrf.mxu0 }
 0x267   : > { %v2528_v27 = vadd.f32 %v1836_v26, %v2525_v24 }
 0x268   : > { %v1190_v28 = vpop.f32.mrf.mxu0 }
 0x269   : > { %v2531_v29 = vadd.f32 %v2525_v24, %v1190_v28  ;;  %v1273_v30 = vsel %vm1269_vm11, %v2528_v27, -inf }
 0x26a   : > { %v1839_v31 = vpop.f32.mrf.mxu0  ;;  %1274 = vmax.xlane.f32.xlu0 %v1273_v30  ;;  %v690_v30 = vpop.xlane.xlu1 %689 }
 0x26b   : > { %v2536_v33 = vadd.f32 %v1839_v31, %v2525_v24  ;;  %v1270_v38 = vsel %vm1269_vm11, %v2531_v29, -inf }
 0x26c   : > { %v1200_v34 = vpop.f32.mrf.mxu0 }
 0x26d   : > { %v2539_v36 = vadd.f32 %v2525_v24, %v1200_v34  ;;  %v1279_v37 = vsel %vm1269_vm11, %v2536_v33, -inf }
 0x26e   : > { %1280 = vmax.xlane.f32.xlu1 %v1279_v37  ;;  %v1842_v39 = vpop.f32.mrf.mxu0  ;;  %1271 = vmax.xlane.f32.xlu0 %v1270_v38  ;;  %v715_v37 = vsel %vm2354_vm3, %v684_v51, 0.0 }
 0x26f   : > { %v2546_v41 = vadd.f32 %v1842_v39, %v2525_v24  ;;  %v1276_v44 = vsel %vm1269_vm11, %v2539_v36, -inf  ;;  %v782_v39 = vsel %vm2371_vm6, %v751_v7, %v715_v37  ;;  %v742_v37 = vsel %vm2371_vm6, %v2440_v35, -1e+30 }
 0x270   : > { %v1210_v40 = vpop.f32.mrf.mxu0 }
 0x271   : > { %v2549_v43 = vadd.f32 %v2525_v24, %v1210_v40  ;;  %v1285_v53 = vsel %vm1269_vm11, %v2546_v41, -inf }
 0x272   : > { %v1845_v45 = vpop.f32.mrf.mxu0  ;;  %1277 = vmax.xlane.f32.xlu1 %v1276_v44 }
 0x273   : > { %v1282_v50 = vsel %vm1269_vm11, %v2549_v43, -inf  ;;  %v2556_v48 = vadd.f32 %v1845_v45, %v2525_v24  ;;  %v716_v45 = vsel %vm2354_vm3, %v686_v56, 0.0 }
 0x274   : > { %v1220_v46 = vpop.f32.mrf.mxu0  ;;  %1283 = vmax.xlane.f32.xlu0 %v1282_v50  ;;  %v755_v50 = vpop.xlane.xlu0 %754 }
 0x275   : > { %v2559_v47 = vadd.f32 %v2525_v24, %v1220_v46  ;;  %v1291_v6 = vsel %vm1269_vm11, %v2556_v48, -inf  ;;  %v783_v46 = vsel %vm2371_vm6, %v753_v11, %v716_v45  ;;  %v744_v45 = vsel %vm2371_vm6, %v2458_v49, -1e+30 }
 0x276   : > { %v1848_v61 = vpop.f32.mrf.mxu0  ;;  %1286 = vmax.xlane.f32.xlu1 %v1285_v53  ;;  %v799_v53 = vsub.f32 %v2364_v60, %v782_v39 }
 0x277   : > { %v1288_v62 = vsel %vm1269_vm11, %v2559_v47, -inf  ;;  %v2566_v2 = vadd.f32 %v1848_v61, %v2525_v24  ;;  %v757_v61 = vpop.xlane.xlu1 %756 }
 0x278   : > { %v1230_v0 = vpop.f32.mrf.mxu0  ;;  %1289 = vmax.xlane.f32.xlu0 %v1288_v62  ;;  %v815_v11 = vsel %vm2627_vm12, %v799_v53, 0.0  ;;  %v748_v53 = vsel %vm2371_vm6, %v2494_v9, -1e+30 }
 0x279   : > { %v2569_v3 = vadd.f32 %v2525_v24, %v1230_v0  ;;  %v1297_v55 = vsel %vm1269_vm11, %v2566_v2, -inf  ;;  %v800_v0 = vsub.f32 %v2359_v58, %v783_v46  ;;  %v747_v46 = vsel %vm2371_vm6, %v2470_v52, -1e+30 }
 0x27a   : > { %v1851_v8 = vpop.f32.mrf.mxu0  ;;  %1292 = vmax.xlane.f32.xlu1 %v1291_v6  ;;  %v718_v6 = vsel %vm2354_vm3, %v690_v30, 0.0  ;;  %v741_v30 = vsel %vm2371_vm6, %v2416_v22, -1e+30 }
 0x27b   : > { %v1294_v10 = vsel %vm1269_vm11, %v2569_v3, -inf  ;;  %v2576_v14 = vadd.f32 %v1851_v8, %v2525_v24  ;;  %v785_v8 = vsel %vm2371_vm6, %v757_v61, %v718_v6  ;;  %v749_v61 = vsel %vm2371_vm6, %v2487_v4, -1e+30 }
 0x27c   : > { %v1240_v13 = vpop.f32.mrf.mxu0  ;;  %1295 = vmax.xlane.f32.xlu0 %v1294_v10  ;;  %v738_v10 = vsel %vm2371_vm6, %v2404_v15, -1e+30 }
 0x27d   : > { %v2579_v16 = vadd.f32 %v2525_v24, %v1240_v13  ;;  %v1303_v28 = vsel %vm1269_vm11, %v2576_v14, -inf }
 0x27e   : > { %v1854_v17 = vpop.f32.mrf.mxu0  ;;  %1298 = vmax.xlane.f32.xlu1 %v1297_v55  ;;  %v739_v55 = vsel %vm2371_vm6, %v2398_v12, -1e+30 }
 0x27f   : > { %v1300_v18 = vsel %vm1269_vm11, %v2579_v16, -inf  ;;  %v2586_v21 = vadd.f32 %v1854_v17, %v2525_v24  ;;  %v816_v17 = vsel %vm2627_vm12, %v800_v0, 0.0 }
 0x280   : > { %v1250_v20 = vpop.f32.mrf.mxu0  ;;  %1301 = vmax.xlane.f32.xlu0 %v1300_v18  ;;  %v802_v18 = vsub.f32 %v2377_v1, %v785_v8 }
 0x281   : > { %3354 = vst [vmem:[#allocation9_spill] sm:$0xff] %v2586_v21  ;;  %v2589_v23 = vadd.f32 %v2525_v24, %v1250_v20  ;;  %v1309_v44 = vsel %vm1269_vm11, %v2586_v21, -inf  ;;  %v740_v20 = vsel %vm2371_vm6, %v2422_v25, -1e+30 }
 0x282   : > { %v1857_v26 = vpop.f32.mrf.mxu1  ;;  %1304 = vmax.xlane.f32.xlu1 %v1303_v28  ;;  %v833_v28 = vmul.f32 1.442695, %v816_v17 }
 0x283   : > { %v1306_v34 = vsel %vm1269_vm11, %v2589_v23, -inf  ;;  %v2603_v40 = vadd.f32 %v1857_v26, %v2525_v24 }
 0x284   : > { %v1260_v31 = vpop.f32.mrf.mxu1  ;;  %1307 = vmax.xlane.f32.xlu0 %v1306_v34 }
 0x285   : > { %v2598_v38 = vadd.f32 %v2525_v24, %v1260_v31  ;;  %3356 = vst [vmem:[#allocation11_spill] sm:$0xff] %v2603_v40  ;;  %v717_v24 = vsel %vm2354_vm3, %v688_v19, 0.0  ;;  %v1315_v56 = vsel %vm1269_vm11, %v2603_v40, -inf  ;;  %v831_v19 = vmul.f32 1.442695, %v815_v11 }
 0x286   : > { %1310 = vmax.xlane.f32.xlu1 %v1309_v44  ;;  %v784_v62 = vsel %vm2371_vm6, %v755_v50, %v717_v24  ;;  %v818_v31 = vsel %vm2627_vm12, %v802_v18, 0.0  ;;  %v743_v44 = vsel %vm2371_vm6, %v2434_v32, -1e+30  ;;  %v745_v50 = vsel %vm2371_vm6, %v2452_v42, -1e+30 }
 0x287   : > { %3355 = vst [vmem:[#allocation10_spill] sm:$0xff] %v2598_v38  ;;  %v1312_v51 = vsel %vm1269_vm11, %v2598_v38, -inf  ;;  %v801_v13 = vsub.f32 %v2386_v5, %v784_v62  ;;  %1899 = vpow2.f32 %v831_v19  ;;  %v837_v39 = vmul.f32 1.442695, %v818_v31 }
 0x288   : > { %1313 = vmax.xlane.f32.xlu0 %v1312_v51  ;;  %1901 = vpow2.f32 %v833_v28  ;;  %v746_v51 = vsel %vm2371_vm6, %v2476_v59, -1e+30 }
 0x289   : > { %v817_v26 = vsel %vm2627_vm12, %v801_v13, 0.0  ;;  %v692_v13 = vpop.xlane.xlu0 %691 }
 0x28a   : > { %1316 = vmax.xlane.f32.xlu1 %v1315_v56  ;;  %v835_v34 = vmul.f32 1.442695, %v817_v26  ;;  %v719_v60 = vsel %vm2354_vm3, %v692_v13, 0.0 }
 0x28c   : > { %758 = vmax.xlane.f32.xlu0 %v738_v10  ;;  %1903 = vpow2.f32 %v835_v34 }
 0x28d   : > { %1905 = vpow2.f32 %v837_v39  ;;  %v696_v17 = vpop.xlane.xlu0 %695 }
 0x28e   : > { %760 = vmax.xlane.f32.xlu1 %v739_v55  ;;  %v694_v55 = vpop.xlane.xlu1 %693 }
 0x290   : > { %762 = vmax.xlane.f32.xlu0 %v740_v20 }
 0x291   : > { %v700_v19 = vpop.xlane.xlu0 %699 }
 0x292   : > { %764 = vmax.xlane.f32.xlu1 %v741_v30  ;;  %v698_v18 = vpop.xlane.xlu1 %697 }
 0x294   : > { %766 = vmax.xlane.f32.xlu0 %v742_v37  ;;  %v2676_v24 = vpop.eup %1899 }
 0x295   : > { %3359 = vst [vmem:[#allocation12_spill] sm:$0xff] %v2676_v24  ;;  %v2681_v62 = vpop.eup %1901  ;;  %v863_v56 = vsel %vm2354_vm3, %v2676_v24, 0.0  ;;  %v2699_v26 = vpop.xlane.xlu0 %703 }
 0x296   : > { %768 = vmax.xlane.f32.xlu1 %v743_v44  ;;  %3360 = vst [vmem:[#allocation13_spill] sm:$0xff] %v2681_v62  ;;  %v864_v6 = vsel %vm2354_vm3, %v2681_v62, 0.0  ;;  %v702_v20 = vpop.xlane.xlu1 %701  ;;  %v720_v62 = vsel %vm2354_vm3, %v694_v55, 0.0 }
 0x298   : > { %770 = vmax.xlane.f32.xlu0 %v744_v45 }
 0x299   : > { %v2686_v0 = vpop.eup %1903  ;;  %v2703_v30 = vpop.xlane.xlu0 %707 }
 0x29a   : > { %772 = vmax.xlane.f32.xlu1 %v745_v50  ;;  %3361 = vst [vmem:[#allocation14_spill] sm:$0xff] %v2686_v0  ;;  %v2691_v8 = vpop.eup %1905  ;;  %v865_v10 = vsel %vm2354_vm3, %v2686_v0, 0.0  ;;  %v2701_v28 = vpop.xlane.xlu1 %705 }
 0x29b   : > { %3362 = vst [vmem:[#allocation15_spill] sm:$0xff] %v2691_v8  ;;  %v866_v11 = vsel %vm2354_vm3, %v2691_v8, 0.0 }
 0x29c   : > { %774 = vmax.xlane.f32.xlu0 %v746_v51 }
 0x29d   : > { %v2707_v34 = vpop.xlane.xlu0 %711 }
 0x29e   : > { %776 = vmax.xlane.f32.xlu1 %v747_v46  ;;  %v2705_v31 = vpop.xlane.xlu1 %709 }
 0x2a0   : > { %778 = vmax.xlane.f32.xlu0 %v748_v53 }
 0x2a2   : > { %780 = vmax.xlane.f32.xlu1 %v749_v61  ;;  %v2709_v37 = vpop.xlane.xlu1 %713 }
 0x2a4   : > { %879 = vadd.xlane.f32.xlu0 %v863_v56 }
 0x2a6   : > { %881 = vadd.xlane.f32.xlu1 %v864_v6 }
 0x2a8   : > { %883 = vadd.xlane.f32.xlu0 %v865_v10 }
 0x2aa   : > { %885 = vadd.xlane.f32.xlu1 %v866_v11 }
 0x2f3   : > { %v2711_v39 = vpop.xlane.xlu0 %1274 }
 0x2f7   : > { %v2713_v44 = vpop.xlane.xlu1 %1280  ;;  %v2715_v45 = vpop.xlane.xlu0 %1271 }
 0x2fb   : > { %v2717_v50 = vpop.xlane.xlu1 %1277 }
 0x2fd   : > { %v2719_v51 = vpop.xlane.xlu0 %1283 }
 0x2ff   : > { %v2721_v46 = vpop.xlane.xlu1 %1286 }
 0x301   : > { %v2723_v53 = vpop.xlane.xlu0 %1289 }
 0x303   : > { %v2725_v61 = vpop.xlane.xlu1 %1292 }
 0x305   : > { %v2727_v56 = vpop.xlane.xlu0 %1295 }
 0x307   : > { %v2729_v6 = vpop.xlane.xlu1 %1298 }
 0x309   : > { %v2731_v10 = vpop.xlane.xlu0 %1301 }
 0x30b   : > { %v2733_v11 = vpop.xlane.xlu1 %1304 }
 0x30d   : > { %v2735_v54 = vpop.xlane.xlu0 %1307 }
 0x30f   : > { %v2737_v5 = vpop.xlane.xlu1 %1310 }
 0x310   : > { %3363 = vst [vmem:[#allocation16_spill] sm:$0xff] %v2737_v5 }
 0x311   : > { %v2739_v1 = vpop.xlane.xlu0 %1313 }
 0x312   : > { %3364 = vst [vmem:[#allocation17_spill] sm:$0xff] %v2739_v1  ;;  %v721_v1 = vsel %vm2354_vm3, %v696_v17, 0.0 }
 0x313   : > { %v2741_v58 = vpop.xlane.xlu1 %1316 }
 0x314   : > { %3365 = vst [vmem:[#allocation18_spill] sm:$0xff] %v2741_v58 }
 0x315   : > { %v759_v8 = vpop.xlane.xlu0 %758 }
 0x316   : > { %v786_v0 = vsel %vm2371_vm6, %v759_v8, %v719_v60 }
 0x317   : > { %v803_v24 = vsub.f32 %v2404_v15, %v786_v0  ;;  %v761_v40 = vpop.xlane.xlu1 %760  ;;  %v722_v0 = vsel %vm2354_vm3, %v698_v18, 0.0 }
 0x318   : > { %v787_v38 = vsel %vm2371_vm6, %v761_v40, %v720_v62 }
 0x319   : > { %v819_v58 = vsel %vm2627_vm12, %v803_v24, 0.0  ;;  %v804_v13 = vsub.f32 %v2398_v12, %v787_v38  ;;  %v763_v21 = vpop.xlane.xlu0 %762 }
 0x31a   : > { %v839_v5 = vmul.f32 1.442695, %v819_v58  ;;  %v788_v60 = vsel %vm2371_vm6, %v763_v21, %v721_v1  ;;  %v723_v58 = vsel %vm2354_vm3, %v700_v19, 0.0 }
 0x31b   : > { %v820_v8 = vsel %vm2627_vm12, %v804_v13, 0.0  ;;  %v805_v40 = vsub.f32 %v2422_v25, %v788_v60  ;;  %v765_v62 = vpop.xlane.xlu1 %764 }
 0x31c   : > { %1907 = vpow2.f32 %v839_v5  ;;  %v841_v55 = vmul.f32 1.442695, %v820_v8  ;;  %v789_v24 = vsel %vm2371_vm6, %v765_v62, %v722_v0  ;;  %v724_v5 = vsel %vm2354_vm3, %v702_v20, 0.0 }
 0x31d   : > { %v821_v1 = vsel %vm2627_vm12, %v805_v40, 0.0  ;;  %v806_v21 = vsub.f32 %v2416_v22, %v789_v24  ;;  %v767_v38 = vpop.xlane.xlu0 %766  ;;  %v725_v40 = vsel %vm2354_vm3, %v2699_v26, 0.0 }
 0x31e   : > { %1909 = vpow2.f32 %v841_v55  ;;  %v843_v17 = vmul.f32 1.442695, %v821_v1  ;;  %v790_v18 = vsel %vm2371_vm6, %v767_v38, %v723_v58  ;;  %v726_v1 = vsel %vm2354_vm3, %v2701_v28, 0.0 }
 0x31f   : > { %v822_v13 = vsel %vm2627_vm12, %v806_v21, 0.0  ;;  %v807_v60 = vsub.f32 %v2440_v35, %v790_v18  ;;  %v769_v19 = vpop.xlane.xlu1 %768 }
 0x320   : > { %1911 = vpow2.f32 %v843_v17  ;;  %v845_v0 = vmul.f32 1.442695, %v822_v13  ;;  %v791_v8 = vsel %vm2371_vm6, %v769_v19, %v724_v5  ;;  %v727_v5 = vsel %vm2354_vm3, %v2703_v30, 0.0 }
 0x321   : > { %v823_v62 = vsel %vm2627_vm12, %v807_v60, 0.0  ;;  %v808_v20 = vsub.f32 %v2434_v32, %v791_v8  ;;  %v771_v55 = vpop.xlane.xlu0 %770  ;;  %v728_v8 = vsel %vm2354_vm3, %v2705_v31, 0.0  ;;  %v1318_v31 = vsub.f32 %v2531_v29, %v2715_v45 }
 0x322   : > { %1913 = vpow2.f32 %v845_v0  ;;  %v847_v24 = vmul.f32 1.442695, %v823_v62  ;;  %v792_v58 = vsel %vm2371_vm6, %v771_v55, %v725_v40  ;;  %v730_v29 = vsel %vm2354_vm3, %v2709_v37, 0.0 }
 0x323   : > { %v824_v21 = vsel %vm2627_vm12, %v808_v20, 0.0  ;;  %v809_v26 = vsub.f32 %v2458_v49, %v792_v58  ;;  %v773_v38 = vpop.xlane.xlu1 %772  ;;  %v729_v58 = vsel %vm2354_vm3, %v2707_v34, 0.0  ;;  %v1319_v34 = vsub.f32 %v2528_v27, %v2711_v39 }
 0x324   : > { %1915 = vpow2.f32 %v847_v24  ;;  %v849_v17 = vmul.f32 1.442695, %v824_v21  ;;  %v793_v18 = vsel %vm2371_vm6, %v773_v38, %v726_v1 }
 0x325   : > { %v825_v13 = vsel %vm2627_vm12, %v809_v26, 0.0  ;;  %v810_v28 = vsub.f32 %v2452_v42, %v793_v18  ;;  %v775_v60 = vpop.xlane.xlu0 %774 }
 0x326   : > { %1917 = vpow2.f32 %v849_v17  ;;  %v851_v19 = vmul.f32 1.442695, %v825_v13  ;;  %v794_v0 = vsel %vm2371_vm6, %v775_v60, %v727_v5 }
 0x327   : > { %v826_v40 = vsel %vm2627_vm12, %v810_v28, 0.0  ;;  %v811_v30 = vsub.f32 %v2476_v59, %v794_v0  ;;  %v777_v62 = vpop.xlane.xlu1 %776 }
 0x328   : > { %1919 = vpow2.f32 %v851_v19  ;;  %v853_v20 = vmul.f32 1.442695, %v826_v40  ;;  %v795_v55 = vsel %vm2371_vm6, %v777_v62, %v728_v8  ;;  %v1334_v8 = vmul.f32 1.442695, %v1318_v31 }
 0x329   : > { %v2812_v24 = vpop.eup %1907  ;;  %v827_v1 = vsel %vm2627_vm12, %v811_v30, 0.0  ;;  %v812_v21 = vsub.f32 %v2470_v52, %v795_v55  ;;  %v779_v26 = vpop.xlane.xlu0 %778  ;;  %v1320_v40 = vsub.f32 %v2539_v36, %v2717_v50  ;;  %v1336_v55 = vmul.f32 1.442695, %v1319_v34 }
 0x32a   : > { %1921 = vpow2.f32 %v853_v20  ;;  %v855_v38 = vmul.f32 1.442695, %v827_v1  ;;  %v796_v17 = vsel %vm2371_vm6, %v779_v26, %v729_v58  ;;  %v867_v18 = vsel %vm2354_vm3, %v2812_v24, 0.0 }
 0x32b   : > { %v2827_v5 = vpop.eup %1909  ;;  %v828_v45 = vsel %vm2627_vm12, %v812_v21, 0.0  ;;  %v813_v13 = vsub.f32 %v2494_v9, %v796_v17  ;;  %v781_v28 = vpop.xlane.xlu1 %780  ;;  %887 = vadd.xlane.f32.xlu0 %v867_v18  ;;  %v1321_v31 = vsub.f32 %v2536_v33, %v2713_v44  ;;  %v1338_v21 = vmul.f32 1.442695, %v1320_v40 }
 0x32c   : > { %1923 = vpow2.f32 %v855_v38  ;;  %v857_v60 = vmul.f32 1.442695, %v828_v45  ;;  %v797_v19 = vsel %vm2371_vm6, %v781_v28, %v730_v29  ;;  %v868_v0 = vsel %vm2354_vm3, %v2827_v5, 0.0 }
 0x32d   : > { %v2842_v37 = vpop.eup %1911  ;;  %v829_v27 = vsel %vm2627_vm12, %v813_v13, 0.0  ;;  %v814_v39 = vsub.f32 %v2487_v4, %v797_v19  ;;  %889 = vadd.xlane.f32.xlu1 %v868_v0  ;;  %v1322_v26 = vsub.f32 %v2549_v43, %v2719_v51  ;;  %v1340_v44 = vmul.f32 1.442695, %v1321_v31 }
 0x32e   : > { %1925 = vpow2.f32 %v857_v60  ;;  %v859_v30 = vmul.f32 1.442695, %v829_v27  ;;  %v869_v62 = vsel %vm2354_vm3, %v2842_v37, 0.0  ;;  %v1323_v38 = vsub.f32 %v2546_v41, %v2721_v46 }
 0x32f   : > { %v2852_v20 = vpop.eup %1913  ;;  %v830_v58 = vsel %vm2627_vm12, %v814_v39, 0.0  ;;  %891 = vadd.xlane.f32.xlu0 %v869_v62  ;;  %v1342_v43 = vmul.f32 1.442695, %v1322_v26  ;;  %v1324_v51 = vsub.f32 %v2559_v47, %v2723_v53  ;;  %v1325_v46 = vsub.f32 %v2556_v48, %v2725_v61 }
 0x330   : > { %3366 = vst [vmem:[#allocation19_spill] sm:$0xff] %v2852_v20  ;;  %1927 = vpow2.f32 %v859_v30  ;;  %v861_v1 = vmul.f32 1.442695, %v830_v58  ;;  %v870_v36 = vsel %vm2354_vm3, %v2852_v20, 0.0  ;;  %v1344_v41 = vmul.f32 1.442695, %v1323_v38 }
 0x331   : > { %v2861_v50 = vpop.eup %1915  ;;  %1929 = vpow2.f32 %v1334_v8  ;;  %893 = vadd.xlane.f32.xlu1 %v870_v36  ;;  %v1346_v47 = vmul.f32 1.442695, %v1324_v51  ;;  %v1326_v53 = vsub.f32 %v2569_v3, %v2727_v56  ;;  %v1348_v48 = vmul.f32 1.442695, %v1325_v46  ;;  %v3375_v58 = vld [vmem:[#allocation9_spill] sm:$0xff] }
 0x332   : > { %1931 = vpow2.f32 %v861_v1  ;;  %v871_v7 = vsel %vm2354_vm3, %v2861_v50, 0.0  ;;  %v1327_v61 = vsub.f32 %v2566_v2, %v2729_v6  ;;  %v1328_v8 = vsub.f32 %v2579_v16, %v2731_v10 }
 0x333   : > { %v2868_v33 = vpop.eup %1917  ;;  %895 = vadd.xlane.f32.xlu0 %v871_v7  ;;  %1933 = vpow2.f32 %v1336_v55  ;;  %v1350_v56 = vmul.f32 1.442695, %v1326_v53  ;;  %v1329_v6 = vsub.f32 %v2576_v14, %v2733_v11  ;;  %v1330_v10 = vsub.f32 %v2589_v23, %v2735_v54  ;;  %v3374_v11 = vld [vmem:[#allocation16_spill] sm:$0xff]  ;;  %v3376_v54 = vld [vmem:[#allocation17_spill] sm:$0xff]  ;;  %v3377_v23 = vld [vmem:[#allocation10_spill] sm:$0xff] }
 0x334   : > { %3367 = vst [vmem:[#allocation20_spill] sm:$0xff] %v2868_v33  ;;  %v872_v17 = vsel %vm2354_vm3, %v2868_v33, 0.0  ;;  %1935 = vpow2.f32 %v1338_v21  ;;  %v1352_v2 = vmul.f32 1.442695, %v1327_v61  ;;  %v1354_v16 = vmul.f32 1.442695, %v1328_v8 }
 0x335   : > { %v2875_v18 = vpop.eup %1919  ;;  %897 = vadd.xlane.f32.xlu1 %v872_v17  ;;  %1937 = vpow2.f32 %v1340_v44  ;;  %v1356_v14 = vmul.f32 1.442695, %v1329_v6  ;;  %v1331_v31 = vsub.f32 %v3375_v58, %v3374_v11  ;;  %v1358_v21 = vmul.f32 1.442695, %v1330_v10  ;;  %v3378_v17 = vld [vmem:[#allocation18_spill] sm:$0xff] }
 0x336   : > { %3368 = vst [vmem:[#allocation21_spill] sm:$0xff] %v2875_v18  ;;  %v873_v29 = vsel %vm2354_vm3, %v2875_v18, 0.0  ;;  %1939 = vpow2.f32 %v1342_v43  ;;  %v1332_v26 = vsub.f32 %v3377_v23, %v3376_v54  ;;  %v3379_v43 = vld [vmem:[#allocation11_spill] sm:$0xff]  ;;  %v3380_v23 = vld [vmem:[#allocation12_spill] sm:$0xff] }
 0x337   : > { %v2882_v34 = vpop.eup %1921  ;;  %899 = vadd.xlane.f32.xlu0 %v873_v29  ;;  %1941 = vpow2.f32 %v1344_v41  ;;  %v1360_v38 = vmul.f32 1.442695, %v1331_v31  ;;  %v1333_v51 = vsub.f32 %v3379_v43, %v3378_v17  ;;  %v3382_v17 = vld [vmem:[#allocation14_spill] sm:$0xff] }
 0x338   : > { %3369 = vst [vmem:[#allocation22_spill] sm:$0xff] %v2882_v34  ;;  %v874_v45 = vsel %vm2354_vm3, %v2882_v34, 0.0  ;;  %1943 = vpow2.f32 %v1346_v47  ;;  %v1362_v46 = vmul.f32 1.442695, %v1332_v26  ;;  %v927_v26 = vsel %vm2371_vm6, %v3380_v23, 0.0 }
 0x339   : > { %v2889_v13 = vpop.eup %1923  ;;  %901 = vadd.xlane.f32.xlu1 %v874_v45  ;;  %1945 = vpow2.f32 %v1348_v48  ;;  %v1364_v53 = vmul.f32 1.442695, %v1333_v51  ;;  %v929_v43 = vsel %vm2371_vm6, %v3382_v17, 0.0  ;;  %v3383_v51 = vld [vmem:[#allocation15_spill] sm:$0xff] }
 0x33a   : > { %3370 = vst [vmem:[#allocation23_spill] sm:$0xff] %v2889_v13  ;;  %v875_v28 = vsel %vm2354_vm3, %v2889_v13, 0.0  ;;  %1947 = vpow2.f32 %v1350_v56 }
 0x33b   : > { %v2896_v60 = vpop.eup %1925  ;;  %903 = vadd.xlane.f32.xlu0 %v875_v28  ;;  %1949 = vpow2.f32 %v1352_v2 }
 0x33c   : > { %3371 = vst [vmem:[#allocation24_spill] sm:$0xff] %v2896_v60  ;;  %v876_v19 = vsel %vm2354_vm3, %v2896_v60, 0.0  ;;  %1951 = vpow2.f32 %v1354_v16 }
 0x33d   : > { %v2903_v0 = vpop.eup %1927  ;;  %905 = vadd.xlane.f32.xlu1 %v876_v19  ;;  %1953 = vpow2.f32 %v1356_v14 }
 0x33e   : > { %3372 = vst [vmem:[#allocation25_spill] sm:$0xff] %v2903_v0  ;;  %v2905_v3 = vpop.eup %1929  ;;  %v877_v27 = vsel %vm2354_vm3, %v2903_v0, 0.0  ;;  %1955 = vpow2.f32 %v1358_v21 }
 0x33f   : > { %v2912_v39 = vpop.eup %1931  ;;  %907 = vadd.xlane.f32.xlu0 %v877_v27  ;;  %v1366_v62 = vsel %vm1269_vm11, %v2905_v3, 0.0  ;;  %1957 = vpow2.f32 %v1360_v38 }
 0x340   : > { %3373 = vst [vmem:[#allocation26_spill] sm:$0xff] %v2912_v39  ;;  %v878_v40 = vsel %vm2354_vm3, %v2912_v39, 0.0  ;;  %v2919_v30 = vpop.eup %1933  ;;  %1959 = vpow2.f32 %v1362_v46  ;;  %v931_v46 = vsel %vm2371_vm6, %v2812_v24, 0.0 }
 0x341   : > { %909 = vadd.xlane.f32.xlu1 %v878_v40  ;;  %v2925_v55 = vpop.eup %1935  ;;  %v1369_v1 = vsel %vm1269_vm11, %v2919_v30, 0.0  ;;  %1961 = vpow2.f32 %v1364_v53  ;;  %v933_v53 = vsel %vm2371_vm6, %v2842_v37, 0.0 }
 0x342   : > { %v2931_v36 = vpop.eup %1937  ;;  %v1372_v7 = vsel %vm1269_vm11, %v2925_v55, 0.0 }
 0x343   : > { %1367 = vadd.xlane.f32.xlu0 %v1366_v62  ;;  %v2937_v44 = vpop.eup %1939  ;;  %v1375_v29 = vsel %vm1269_vm11, %v2931_v36, 0.0 }
 0x344   : > { %v2943_v41 = vpop.eup %1941  ;;  %v1378_v45 = vsel %vm1269_vm11, %v2937_v44, 0.0 }
 0x345   : > { %1370 = vadd.xlane.f32.xlu1 %v1369_v1  ;;  %v2947_v47 = vpop.eup %1943  ;;  %v1381_v28 = vsel %vm1269_vm11, %v2943_v41, 0.0 }
 0x346   : > { %v2951_v48 = vpop.eup %1945  ;;  %v1384_v61 = vsel %vm1269_vm11, %v2947_v47, 0.0 }
 0x347   : > { %1373 = vadd.xlane.f32.xlu0 %v1372_v7  ;;  %v2955_v19 = vpop.eup %1947  ;;  %v1387_v56 = vsel %vm1269_vm11, %v2951_v48, 0.0  ;;  %v3381_v7 = vld [vmem:[#allocation13_spill] sm:$0xff] }
 0x348   : > { %v2959_v8 = vpop.eup %1949  ;;  %v1390_v27 = vsel %vm1269_vm11, %v2955_v19, 0.0  ;;  %v928_v38 = vsel %vm2371_vm6, %v3381_v7, 0.0 }
 0x349   : > { %1376 = vadd.xlane.f32.xlu1 %v1375_v29  ;;  %v2963_v2 = vpop.eup %1951  ;;  %v1393_v6 = vsel %vm1269_vm11, %v2959_v8, 0.0  ;;  %v930_v29 = vsel %vm2371_vm6, %v3383_v51, 0.0 }
 0x34a   : > { %v2967_v40 = vpop.eup %1953  ;;  %v1396_v16 = vsel %vm1269_vm11, %v2963_v2, 0.0 }
 0x34b   : > { %1379 = vadd.xlane.f32.xlu0 %v1378_v45  ;;  %v2971_v10 = vpop.eup %1955  ;;  %v1399_v62 = vsel %vm1269_vm11, %v2967_v40, 0.0  ;;  %v932_v45 = vsel %vm2371_vm6, %v2827_v5, 0.0 }
 0x34c   : > { %v2975_v14 = vpop.eup %1957  ;;  %v1402_v11 = vsel %vm1269_vm11, %v2971_v10, 0.0 }
 0x34d   : > { %1382 = vadd.xlane.f32.xlu1 %v1381_v28  ;;  %v2979_v58 = vpop.eup %1959  ;;  %v1405_v31 = vsel %vm1269_vm11, %v2975_v14, 0.0  ;;  %v934_v28 = vsel %vm2371_vm6, %v2852_v20, 0.0 }
 0x34e   : > { %v2983_v1 = vpop.eup %1961  ;;  %v1408_v21 = vsel %vm1269_vm11, %v2979_v58, 0.0 }
 0x34f   : > { %1385 = vadd.xlane.f32.xlu0 %v1384_v61  ;;  %v1411_v54 = vsel %vm1269_vm11, %v2983_v1, 0.0  ;;  %v935_v61 = vsel %vm2371_vm6, %v2861_v50, 0.0 }
 0x351   : > { %1388 = vadd.xlane.f32.xlu1 %v1387_v56  ;;  %v936_v56 = vsel %vm2371_vm6, %v2868_v33, 0.0 }
 0x353   : > { %1391 = vadd.xlane.f32.xlu0 %v1390_v27  ;;  %v937_v27 = vsel %vm2371_vm6, %v2875_v18, 0.0 }
 0x355   : > { %1394 = vadd.xlane.f32.xlu1 %v1393_v6  ;;  %v938_v6 = vsel %vm2371_vm6, %v2882_v34, 0.0 }
 0x357   : > { %1397 = vadd.xlane.f32.xlu0 %v1396_v16  ;;  %v939_v16 = vsel %vm2371_vm6, %v2889_v13, 0.0 }
 0x359   : > { %1400 = vadd.xlane.f32.xlu1 %v1399_v62  ;;  %v940_v62 = vsel %vm2371_vm6, %v2896_v60, 0.0 }
 0x35b   : > { %1403 = vadd.xlane.f32.xlu0 %v1402_v11  ;;  %v941_v11 = vsel %vm2371_vm6, %v2903_v0, 0.0 }
 0x35d   : > { %1406 = vadd.xlane.f32.xlu1 %v1405_v31  ;;  %v942_v31 = vsel %vm2371_vm6, %v2912_v39, 0.0 }
 0x35f   : > { %1409 = vadd.xlane.f32.xlu0 %v1408_v21  ;;  %v3037_v21 = vpop.xlane.xlu0 %879 }
 0x361   : > { %1412 = vadd.xlane.f32.xlu1 %v1411_v54  ;;  %v3039_v54 = vpop.xlane.xlu1 %881 }
 0x363   : > { %943 = vadd.xlane.f32.xlu0 %v927_v26  ;;  %v3041_v26 = vpop.xlane.xlu0 %883 }
 0x365   : > { %945 = vadd.xlane.f32.xlu1 %v928_v38  ;;  %v3043_v38 = vpop.xlane.xlu1 %885 }
 0x367   : > { %947 = vadd.xlane.f32.xlu0 %v929_v43 }
 0x369   : > { %949 = vadd.xlane.f32.xlu1 %v930_v29 }
 0x36b   : > { %951 = vadd.xlane.f32.xlu0 %v931_v46 }
 0x36d   : > { %953 = vadd.xlane.f32.xlu1 %v932_v45 }
 0x36f   : > { %955 = vadd.xlane.f32.xlu0 %v933_v53 }
 0x371   : > { %957 = vadd.xlane.f32.xlu1 %v934_v28 }
 0x373   : > { %959 = vadd.xlane.f32.xlu0 %v935_v61 }
 0x375   : > { %961 = vadd.xlane.f32.xlu1 %v936_v56 }
 0x377   : > { %963 = vadd.xlane.f32.xlu0 %v937_v27 }
 0x379   : > { %965 = vadd.xlane.f32.xlu1 %v938_v6 }
 0x37b   : > { %967 = vadd.xlane.f32.xlu0 %v939_v16 }
 0x37d   : > { %969 = vadd.xlane.f32.xlu1 %v940_v62 }
 0x37f   : > { %971 = vadd.xlane.f32.xlu0 %v941_v11 }
 0x381   : > { %973 = vadd.xlane.f32.xlu1 %v942_v31 }
 0x3b4   : > { %v3045_v43 = vpop.xlane.xlu0 %887 }
 0x3b6   : > { %v3047_v29 = vpop.xlane.xlu1 %889 }
 0x3b8   : > { %v3049_v46 = vpop.xlane.xlu0 %891 }
 0x3ba   : > { %v3051_v45 = vpop.xlane.xlu1 %893 }
 0x3bc   : > { %v3053_v53 = vpop.xlane.xlu0 %895 }
 0x3be   : > { %v3055_v28 = vpop.xlane.xlu1 %897 }
 0x3c0   : > { %v3057_v61 = vpop.xlane.xlu0 %899 }
 0x3c2   : > { %v3059_v56 = vpop.xlane.xlu1 %901 }
 0x3c4   : > { %v3061_v27 = vpop.xlane.xlu0 %903 }
 0x3c6   : > { %v3063_v6 = vpop.xlane.xlu1 %905 }
 0x3c8   : > { %v3065_v16 = vpop.xlane.xlu0 %907 }
 0x3ca   : > { %v3067_v62 = vpop.xlane.xlu1 %909 }
 0x3cc   : > { %v1368_v11 = vpop.xlane.xlu0 %1367 }
 0x3cd   : > { %1963 = vrcp.f32 %v1368_v11 }
 0x3ce   : > { %v1371_v31 = vpop.xlane.xlu1 %1370 }
 0x3cf   : > { %1965 = vrcp.f32 %v1371_v31 }
 0x3d0   : > { %v1374_v39 = vpop.xlane.xlu0 %1373 }
 0x3d2   : > { %v1377_v60 = vpop.xlane.xlu1 %1376 }
 0x3d3   : > { %1967 = vrcp.f32 %v1377_v60 }
 0x3d4   : > { %1969 = vrcp.f32 %v1374_v39  ;;  %v1380_v0 = vpop.xlane.xlu0 %1379 }
 0x3d5   : > { %1971 = vrcp.f32 %v1380_v0 }
 0x3d6   : > { %v1383_v34 = vpop.xlane.xlu1 %1382 }
 0x3d7   : > { %1973 = vrcp.f32 %v1383_v34 }
 0x3d8   : > { %v1386_v13 = vpop.xlane.xlu0 %1385 }
 0x3d9   : > { %1975 = vrcp.f32 %v1386_v13 }
 0x3da   : > { %v1964_v4 = vpop.eup %1963  ;;  %v1389_v33 = vpop.xlane.xlu1 %1388 }
 0x3db   : > { %v1430_v18 = vmul.f32 %v1964_v4, %v2905_v3  ;;  %1977 = vrcp.f32 %v1389_v33 }
 0x3dc   : > { %v1966_v52 = vpop.eup %1965  ;;  %v1392_v20 = vpop.xlane.xlu0 %1391 }
 0x3dd   : > { %1979 = vrcp.f32 %v1392_v20  ;;  %1462 = vrot.lane.b32.xlu0 %v1430_v18, %s2067_s12  ;;  %v1431_v60 = vmul.f32 %v1966_v52, %v2919_v30 }
 0x3de   : > { %v1395_v39 = vpop.xlane.xlu1 %1394 }
 0x3df   : > { %1464 = vrot.lane.b32.xlu1 %v1431_v60, %s2067_s12  ;;  %1981 = vrcp.f32 %v1395_v39 }
 0x3e0   : > { %v1968_v0 = vpop.eup %1967  ;;  %v1398_v34 = vpop.xlane.xlu0 %1397 }
 0x3e1   : > { %v1970_v13 = vpop.eup %1969  ;;  %1983 = vrcp.f32 %v1398_v34  ;;  %v1433_v11 = vmul.f32 %v1968_v0, %v2931_v36 }
 0x3e2   : > { %v1972_v4 = vpop.eup %1971  ;;  %v1401_v3 = vpop.xlane.xlu1 %1400  ;;  %v1432_v52 = vmul.f32 %v1970_v13, %v2925_v55 }
 0x3e3   : > { %1468 = vrot.lane.b32.xlu1 %v1433_v11, %s2067_s12  ;;  %v1434_v20 = vmul.f32 %v1972_v4, %v2937_v44  ;;  %1985 = vrcp.f32 %v1401_v3 }
 0x3e4   : > { %v1404_v33 = vpop.xlane.xlu0 %1403  ;;  %v1974_v18 = vpop.eup %1973 }
 0x3e5   : > { %1987 = vrcp.f32 %v1404_v33  ;;  %1470 = vrot.lane.b32.xlu0 %v1434_v20, %s2067_s12  ;;  %v1435_v44 = vmul.f32 %v1974_v18, %v2943_v41 }
 0x3e6   : > { %v1976_v30 = vpop.eup %1975  ;;  %v1407_v31 = vpop.xlane.xlu1 %1406 }
 0x3e7   : > { %1466 = vrot.lane.b32.xlu1 %v1432_v52, %s2067_s12  ;;  %v1436_v36 = vmul.f32 %v1976_v30, %v2947_v47  ;;  %1989 = vrcp.f32 %v1407_v31 }
 0x3e8   : > { %v1410_v60 = vpop.xlane.xlu0 %1409  ;;  %v1978_v39 = vpop.eup %1977 }
 0x3e9   : > { %1991 = vrcp.f32 %v1410_v60  ;;  %1474 = vrot.lane.b32.xlu0 %v1436_v36, %s2067_s12  ;;  %v1437_v47 = vmul.f32 %v1978_v39, %v2951_v48 }
 0x3ea   : > { %v1980_v0 = vpop.eup %1979  ;;  %v1413_v34 = vpop.xlane.xlu1 %1412 }
 0x3eb   : > { %1472 = vrot.lane.b32.xlu1 %v1435_v44, %s2067_s12  ;;  %v1438_v55 = vmul.f32 %v1980_v0, %v2955_v19  ;;  %1993 = vrcp.f32 %v1413_v34 }
 0x3ec   : > { %v1982_v13 = vpop.eup %1981 }
 0x3ed   : > { %1478 = vrot.lane.b32.xlu0 %v1438_v55, %s2067_s12  ;;  %v1439_v41 = vmul.f32 %v1982_v13, %v2959_v8 }
 0x3ee   : > { %v1984_v11 = vpop.eup %1983  ;;  %v946_v31 = vpop.xlane.xlu1 %945 }
 0x3ef   : > { %1476 = vrot.lane.b32.xlu1 %v1437_v47, %s2067_s12  ;;  %v1440_v4 = vmul.f32 %v1984_v11, %v2963_v2  ;;  %v914_v47 = vsel %vm2354_vm3, %v3043_v38, 1.0  ;;  %v915_v11 = vsel %vm2354_vm3, %v3045_v43, 1.0  ;;  %v917_v43 = vsel %vm2354_vm3, %v3049_v46, 1.0 }
 0x3f0   : > { %v1986_v3 = vpop.eup %1985 }
 0x3f1   : > { %1482 = vrot.lane.b32.xlu0 %v1440_v4, %s2067_s12  ;;  %v1441_v48 = vmul.f32 %v1986_v3, %v2967_v40 }
 0x3f2   : > { %v1988_v20 = vpop.eup %1987  ;;  %v950_v40 = vpop.xlane.xlu1 %949 }
 0x3f3   : > { %1480 = vrot.lane.b32.xlu1 %v1439_v41, %s2067_s12  ;;  %v1442_v19 = vmul.f32 %v1988_v20, %v2971_v10  ;;  %v944_v10 = vpop.xlane.xlu0 %943  ;;  %v913_v41 = vsel %vm2354_vm3, %v3041_v26, 1.0  ;;  %v3385_v20 = vld [vmem:[#allocation3_spill] sm:$0xff] }
 0x3f4   : > { %v1990_v33 = vpop.eup %1989 }
 0x3f5   : > { %1486 = vrot.lane.b32.xlu0 %v1442_v19, %s2067_s12  ;;  %v1443_v52 = vmul.f32 %v1990_v33, %v2975_v14 }
 0x3f6   : > { %v1992_v18 = vpop.eup %1991  ;;  %v954_v39 = vpop.xlane.xlu1 %953 }
 0x3f7   : > { %1484 = vrot.lane.b32.xlu1 %v1441_v48, %s2067_s12  ;;  %v1444_v2 = vmul.f32 %v1992_v18, %v2979_v58  ;;  %v948_v36 = vpop.xlane.xlu0 %947  ;;  %v911_v58 = vsel %vm2354_vm3, %v3037_v21, 1.0  ;;  %v978_v21 = vsel %vm2371_vm6, %v950_v40, %v914_v47  ;;  %v916_v48 = vsel %vm2354_vm3, %v3047_v29, 1.0  ;;  %v3386_v18 = vld [vmem:[#allocation5_spill] sm:$0xff] }
 0x3f8   : > { %v1994_v8 = vpop.eup %1993  ;;  %v975_v14 = vsel %vm2371_vm6, %v944_v10, %v911_v58  ;;  %v977_v19 = vsel %vm2371_vm6, %v948_v36, %v913_v41  ;;  %v921_v36 = vsel %vm2354_vm3, %v3057_v61, 1.0  ;;  %v924_v41 = vsel %vm2354_vm3, %v3063_v6, 1.0 }
 0x3f9   : > { %1490 = vrot.lane.b32.xlu0 %v1444_v2, %s2067_s12  ;;  %v1445_v30 = vmul.f32 %v1994_v8, %v2983_v1  ;;  %v912_v1 = vsel %vm2354_vm3, %v3039_v54, 1.0  ;;  %1995 = vrcp.f32 %v975_v14  ;;  %v3384_v54 = vld [vmem:[#allocation4_spill] sm:$0xff]  ;;  %v980_v2 = vsel %vm2371_vm6, %v954_v39, %v916_v48 }
 0x3fa   : > { %v958_v0 = vpop.xlane.xlu1 %957  ;;  %v976_v55 = vsel %vm2371_vm6, %v946_v31, %v912_v1  ;;  %v3387_v31 = vld [vmem:[#allocation6_spill] sm:$0xff] }
 0x3fb   : > { %1488 = vrot.lane.b32.xlu1 %v1443_v52, %s2067_s12  ;;  %v952_v60 = vpop.xlane.xlu0 %951  ;;  %1997 = vrcp.f32 %v976_v55  ;;  %v919_v52 = vsel %vm2354_vm3, %v3053_v53, 1.0  ;;  %v922_v55 = vsel %vm2354_vm3, %v3059_v56, 1.0  ;;  %v925_v56 = vsel %vm2354_vm3, %v3065_v16, 1.0 }
 0x3fc   : > { %1999 = vtanh.f32 %v3384_v54  ;;  %v979_v3 = vsel %vm2371_vm6, %v952_v60, %v915_v11  ;;  %v3388_v60 = vld [vmem:[#allocation2_spill] sm:$0xff] }
 0x3fd   : > { %2001 = vrcp.f32 %v978_v21  ;;  %vm1023_vm1 = vcmp.lt.s32.totalorder %v3388_v60, 3 }
 0x3fe   : > { %v962_v13 = vpop.xlane.xlu1 %961  ;;  %2003 = vtanh.f32 %v3385_v20 }
 0x3ff   : > { %1492 = vrot.lane.b32.xlu1 %v1445_v30, %s2067_s12  ;;  %v956_v44 = vpop.xlane.xlu0 %955  ;;  %2005 = vrcp.f32 %v979_v3  ;;  %v918_v30 = vsel %vm2354_vm3, %v3051_v45, 1.0 }
 0x400   : > { %v981_v33 = vsel %vm2371_vm6, %v956_v44, %v917_v43  ;;  %2007 = vrcp.f32 %v977_v19  ;;  %v982_v53 = vsel %vm2371_vm6, %v958_v0, %v918_v30  ;;  %v920_v44 = vsel %vm2354_vm3, %v3055_v28, 1.0 }
 0x401   : > { %2009 = vtanh.f32 %v3386_v18  ;;  %v923_v28 = vsel %vm2354_vm3, %v3061_v27, 1.0  ;;  %v926_v18 = vsel %vm2354_vm3, %v3067_v62, 1.0 }
 0x402   : > { %v966_v38 = vpop.xlane.xlu1 %965  ;;  %2011 = vrcp.f32 %v981_v33 }
 0x403   : > { %v960_v34 = vpop.xlane.xlu0 %959  ;;  %2013 = vtanh.f32 %v2404_v15  ;;  %v986_v21 = vsel %vm2371_vm6, %v966_v38, %v922_v55  ;;  %v3393_v55 = vld [vmem:[#allocation8_spill] sm:$0xff] }
 0x404   : > { %v983_v29 = vsel %vm2371_vm6, %v960_v34, %v919_v52  ;;  %2015 = vrcp.f32 %v980_v2 }
 0x405   : > { %2017 = vtanh.f32 %v3387_v31 }
 0x406   : > { %v3142_v46 = vpop.xlane.xlu1 %969  ;;  %v1996_v8 = vpop.eup %1995  ;;  %2019 = vrcp.f32 %v983_v29 }
 0x407   : > { %v964_v4 = vpop.xlane.xlu0 %963  ;;  %v1007_v40 = vmul.f32 %v1996_v8, %v3380_v23  ;;  %2021 = vtanh.f32 %v2422_v25  ;;  %v984_v25 = vsel %vm2371_vm6, %v962_v13, %v920_v44  ;;  %v3391_v44 = vld [vmem:[#allocation21_spill] sm:$0xff] }
 0x408   : > { %v1998_v10 = vpop.eup %1997  ;;  %v985_v45 = vsel %vm2371_vm6, %v964_v4, %v921_v36  ;;  %2023 = vrcp.f32 %v982_v53  ;;  %v3389_v53 = vld [vmem:[#allocation19_spill] sm:$0xff] }
 0x409   : > { %v2000_v39 = vpop.eup %1999  ;;  %v1008_v61 = vmul.f32 %v1998_v10, %v3381_v7  ;;  %2025 = vtanh.f32 %v2398_v12 }
 0x40a   : > { %v3164_v0 = vpop.xlane.xlu1 %973  ;;  %v2002_v58 = vpop.eup %2001  ;;  %2027 = vrcp.f32 %v985_v45  ;;  %v1040_v7 = vsel %vm1023_vm1, %v2000_v39, %v1007_v40  ;;  %v3390_v45 = vld [vmem:[#allocation7_spill] sm:$0xff] }
 0x40b   : > { %v968_v26 = vpop.xlane.xlu0 %967  ;;  %v2004_v23 = vpop.eup %2003  ;;  %2029 = vtanh.f32 %v2440_v35  ;;  %v1010_v47 = vmul.f32 %v2002_v58, %v3383_v51 }
 0x40c   : > { %v2006_v1 = vpop.eup %2005  ;;  %v987_v12 = vsel %vm2371_vm6, %v968_v26, %v923_v28  ;;  %2031 = vrcp.f32 %v984_v25  ;;  %v1041_v27 = vsel %vm1023_vm1, %v2004_v23, %v1008_v61 }
 0x40d   : > { %v2008_v35 = vpop.eup %2007  ;;  %2033 = vtanh.f32 %v2416_v22  ;;  %v1011_v54 = vmul.f32 %v2006_v1, %v2812_v24 }
 0x40e   : > { %v2010_v4 = vpop.eup %2009  ;;  %2035 = vrcp.f32 %v987_v12  ;;  %v1009_v20 = vmul.f32 %v2008_v35, %v3382_v17 }
 0x40f   : > { %v972_v15 = vpop.xlane.xlu0 %971  ;;  %v2012_v51 = vpop.eup %2011  ;;  %2037 = vtanh.f32 %v2458_v49  ;;  %v1043_v16 = vsel %vm1023_vm1, %v2010_v4, %v1010_v47  ;;  %v988_v49 = vsel %vm2371_vm6, %v3142_v46, %v924_v41  ;;  %v3394_v47 = vld [vmem:[#allocation23_spill] sm:$0xff] }
 0x410   : > { %v989_v22 = vsel %vm2371_vm6, %v972_v15, %v925_v56  ;;  %v2014_v3 = vpop.eup %2013  ;;  %2039 = vrcp.f32 %v986_v21  ;;  %v1013_v17 = vmul.f32 %v2012_v51, %v2842_v37  ;;  %v3395_v51 = vld [vmem:[#allocation22_spill] sm:$0xff] }
 0x411   : > { %v2016_v24 = vpop.eup %2015  ;;  %2041 = vtanh.f32 %v2434_v32  ;;  %v1044_v6 = vsel %vm1023_vm1, %v2014_v3, %v1011_v54 }
 0x412   : > { %v2018_v43 = vpop.eup %2017  ;;  %2043 = vrcp.f32 %v989_v22  ;;  %v1012_v37 = vmul.f32 %v2016_v24, %v2827_v5 }
 0x413   : > { %v2020_v48 = vpop.eup %2019  ;;  %2045 = vtanh.f32 %v2476_v59  ;;  %v1042_v52 = vsel %vm1023_vm1, %v2018_v43, %v1009_v20  ;;  %v990_v59 = vsel %vm2371_vm6, %v3164_v0, %v926_v18  ;;  %v3396_v20 = vld [vmem:[#allocation25_spill] sm:$0xff] }
 0x414   : > { %v2022_v26 = vpop.eup %2021  ;;  %2047 = vrcp.f32 %v988_v49  ;;  %v1015_v30 = vmul.f32 %v2020_v48, %v2861_v50 }
 0x415   : > { %v2024_v46 = vpop.eup %2023  ;;  %2049 = vtanh.f32 %v2452_v42  ;;  %v1046_v57 = vsel %vm1023_vm1, %v2022_v26, %v1013_v17  ;;  %v3397_v17 = vld [vmem:[#allocation24_spill] sm:$0xff] }
 0x416   : > { %v2026_v29 = vpop.eup %2025  ;;  %2051 = vtanh.f32 %v2494_v9  ;;  %v1014_v36 = vmul.f32 %v2024_v46, %v3389_v53 }
 0x417   : > { %v2028_v5 = vpop.eup %2027  ;;  %2053 = vrcp.f32 %v990_v59  ;;  %v1045_v42 = vsel %vm1023_vm1, %v2026_v29, %v1012_v37 }
 0x418   : > { %v2030_v10 = vpop.eup %2029  ;;  %2055 = vtanh.f32 %v3390_v45  ;;  %v1017_v0 = vmul.f32 %v2028_v5, %v3391_v44 }
 0x419   : > { %v2032_v15 = vpop.eup %2031  ;;  %v1048_v9 = vsel %vm1023_vm1, %v2030_v10, %v1015_v30  ;;  %2057 = vtanh.f32 %v3393_v55 }
 0x41a   : > { %v2034_v50 = vpop.eup %2033 }
 0x41b   : > { %v2036_v61 = vpop.eup %2035  ;;  %v1047_v23 = vsel %vm1023_vm1, %v2034_v50, %v1014_v36 }
 0x41c   : > { %v2038_v25 = vpop.eup %2037  ;;  %v1019_v35 = vmul.f32 %v2036_v61, %v3394_v47 }
 0x41d   : > { %v2040_v1 = vpop.eup %2039 }
 0x41e   : > { %v1018_v22 = vmul.f32 %v2040_v1, %v3395_v51 }
 0x44f   : > { %v1463_v14 = vpop.permute.xlu0 %1462 }
 0x450   : > { %v1511_v34 = vsel %vm1510_vm5, %v1040_v7, %v1463_v14  ;;  %v3392_v7 = vld [vmem:[#allocation20_spill] sm:$0xff] }
 0x451   : > { %1528 = vst.msk [vmem:[%s3172_s16] sm:$0xff] %vm1527_vm13, %v1511_v34  ;;  %v1465_v13 = vpop.permute.xlu1 %1464  ;;  %v1016_v14 = vmul.f32 %v2032_v15, %v3392_v7  ;;  %v2042_v34 = vpop.eup %2041 }
 0x452   : > { %v1512_v11 = vsel %vm1510_vm5, %v1041_v27, %v1465_v13  ;;  %v1050_v27 = vsel %vm1023_vm1, %v2038_v25, %v1017_v0  ;;  %v2044_v21 = vpop.eup %2043 }
 0x453   : > { %1529 = vst.msk [vmem:[%s3172_s16 + $0x8] sm:$0xff] %vm1527_vm13, %v1512_v11  ;;  %v2046_v4 = vpop.eup %2045  ;;  %v1049_v56 = vsel %vm1023_vm1, %v2042_v34, %v1016_v14  ;;  %v1021_v24 = vmul.f32 %v2044_v21, %v3396_v20 }
 0x454   : > { %v2048_v3 = vpop.eup %2047 }
 0x455   : > { %v1469_v38 = vpop.permute.xlu1 %1468  ;;  %v2050_v49 = vpop.eup %2049  ;;  %v1020_v48 = vmul.f32 %v2048_v3, %v3397_v17 }
 0x456   : > { %v1514_v19 = vsel %vm1510_vm5, %v1043_v16, %v1469_v38  ;;  %v1052_v16 = vsel %vm1023_vm1, %v2046_v4, %v1019_v35  ;;  %v2052_v43 = vpop.eup %2051 }
 0x457   : > { %1531 = vst.msk [vmem:[%s3172_s16 + $0x18] sm:$0xff] %vm1527_vm13, %v1514_v19  ;;  %v1471_v33 = vpop.permute.xlu0 %1470  ;;  %v1054_v18 = vsel %vm1023_vm1, %v2052_v43, %v1021_v24 }
 0x458   : > { %v1515_v32 = vsel %vm1510_vm5, %v1044_v6, %v1471_v33  ;;  %v1051_v6 = vsel %vm1023_vm1, %v2050_v49, %v1018_v22 }
 0x459   : > { %1532 = vst.msk [vmem:[%s3172_s16 + $0x20] sm:$0xff] %vm1527_vm13, %v1515_v32  ;;  %v1467_v2 = vpop.permute.xlu1 %1466  ;;  %v2054_v32 = vpop.eup %2053 }
 0x45a   : > { %v1513_v8 = vsel %vm1510_vm5, %v1042_v52, %v1467_v2  ;;  %v2056_v52 = vpop.eup %2055 }
 0x45b   : > { %1530 = vst.msk [vmem:[%s3172_s16 + $0x10] sm:$0xff] %vm1527_vm13, %v1513_v8  ;;  %v1475_v62 = vpop.permute.xlu0 %1474  ;;  %v1053_v46 = vsel %vm1023_vm1, %v2056_v52, %v1020_v48  ;;  %v3398_v8 = vld [vmem:[#allocation26_spill] sm:$0xff] }
 0x45c   : > { %v1517_v63 = vsel %vm1510_vm5, %v1046_v57, %v1475_v62  ;;  %v1022_v29 = vmul.f32 %v2054_v32, %v3398_v8  ;;  %v2058_v62 = vpop.eup %2057 }
 0x45d   : > { %1534 = vst.msk [vmem:[%s3172_s16 + $0x30] sm:$0xff] %vm1527_vm13, %v1517_v63  ;;  %v1473_v31 = vpop.permute.xlu1 %1472 }
 0x45e   : > { %v1516_v40 = vsel %vm1510_vm5, %v1045_v42, %v1473_v31  ;;  %v1055_v30 = vsel %vm1023_vm1, %v2058_v62, %v1022_v29 }
 0x45f   : > { %1533 = vst.msk [vmem:[%s3172_s16 + $0x28] sm:$0xff] %vm1527_vm13, %v1516_v40  ;;  %v1479_v39 = vpop.permute.xlu0 %1478 }
 0x460   : > { %v1519_v58 = vsel %vm1510_vm5, %v1048_v9, %v1479_v39 }
 0x461   : > { %1536 = vst.msk [vmem:[%s3172_s16 + $0x40] sm:$0xff] %vm1527_vm13, %v1519_v58  ;;  %v1477_v28 = vpop.permute.xlu1 %1476 }
 0x462   : > { %v1518_v12 = vsel %vm1510_vm5, %v1047_v23, %v1477_v28 }
 0x463   : > { %1535 = vst.msk [vmem:[%s3172_s16 + $0x38] sm:$0xff] %vm1527_vm13, %v1518_v12  ;;  %v1483_v13 = vpop.permute.xlu0 %1482 }
 0x464   : > { %v1521_v11 = vsel %vm1510_vm5, %v1050_v27, %v1483_v13 }
 0x465   : > { %1538 = vst.msk [vmem:[%s3172_s16 + $0x50] sm:$0xff] %vm1527_vm13, %v1521_v11  ;;  %v1481_v54 = vpop.permute.xlu1 %1480 }
 0x466   : > { %v1520_v41 = vsel %vm1510_vm5, %v1049_v56, %v1481_v54 }
 0x467   : > { %1537 = vst.msk [vmem:[%s3172_s16 + $0x48] sm:$0xff] %vm1527_vm13, %v1520_v41  ;;  %v1487_v38 = vpop.permute.xlu0 %1486 }
 0x468   : > { %v1523_v19 = vsel %vm1510_vm5, %v1052_v16, %v1487_v38 }
 0x469   : > { %1540 = vst.msk [vmem:[%s3172_s16 + $0x60] sm:$0xff] %vm1527_vm13, %v1523_v19  ;;  %v1485_v33 = vpop.permute.xlu1 %1484 }
 0x46a   : > { %v1522_v26 = vsel %vm1510_vm5, %v1051_v6, %v1485_v33 }
 0x46b   : > { %1539 = vst.msk [vmem:[%s3172_s16 + $0x58] sm:$0xff] %vm1527_vm13, %v1522_v26  ;;  %v1491_v2 = vpop.permute.xlu0 %1490 }
 0x46c   : > { %v1525_v37 = vsel %vm1510_vm5, %v1054_v18, %v1491_v2 }
 0x46d   : > { %1542 = vst.msk [vmem:[%s3172_s16 + $0x70] sm:$0xff] %vm1527_vm13, %v1525_v37  ;;  %v1489_v59 = vpop.permute.xlu1 %1488 }
 0x46e   : > { %v1524_v57 = vsel %vm1510_vm5, %v1053_v46, %v1489_v59 }
 0x46f   : > { %1541 = vst.msk [vmem:[%s3172_s16 + $0x68] sm:$0xff] %vm1527_vm13, %v1524_v57 }
 0x471   : > { %v1493_v5 = vpop.permute.xlu1 %1492 }
 0x472   : > { %v1526_v63 = vsel %vm1510_vm5, %v1055_v30, %v1493_v5 }
 0x473   : > { %1543 = vst.msk [vmem:[%s3172_s16 + $0x78] sm:$0xff] %vm1527_vm13, %v1526_v63 }
 0x474 PF: > { %s15_s18 = sadd.s32 1, %s2065_s18  }
 0x475   : > { %p12_p4 = scmp.ge.s32.totalorder %s15_s18, 4  }
 0x477   :  { %14 = sbr.rel (!%p12_p4) target bundleno = 1 (0x1), region = 70 }

</bundles_post_ra>
